<compile_context>
chip_gen: v7x
topology: tpu7x:2x2x1
jax: 0.10.0
libtpu: 0.0.40
codegen_flags: <defaults>
</compile_context>

<pallas_src>
import numpy as np

import jax
import jax.numpy as jnp
from jax.experimental import pallas as pl
from jax.experimental.pallas import tpu as pltpu


def _round_up(x, m):
    return (x + m - 1) // m * m


def _pick_batch_tile(B, batch_block):
    bp8 = _round_up(max(B, 1), 8)
    if bp8 <= 8:
        return 8, 8
    # >= 2 grid steps so both of v7x's TensorCores get work; tiles are a
    # multiple of 8 and capped at batch_block to bound per-step VMEM.
    tb = max(8, min(batch_block, _round_up((bp8 + 1) // 2, 8)))
    bp = _round_up(bp8, tb)
    return tb, bp


# ----------------------------------------------------------------------------
# The fused Pallas kernel
# ----------------------------------------------------------------------------
def _lenet_kernel(x_ref, w1_ref, b1_ref, w2_ref, b2_ref, mf_ref,
                  bf1_ref, wf2_ref, bf2_ref, wf3_ref, bf3_ref, out_ref):
    f32, bf16 = jnp.float32, jnp.bfloat16
    tb = x_ref.shape[0]

    # --- stage 1: Conv2d(1->6, k5, pad2) + Tanh + vertical half of AvgPool ---
    # 28 overlapping 160-lane windows (5 consecutive padded rows each),
    # sublane-stacked into ONE big-M matmul.  Even conv output rows go in the
    # first half, odd rows in the second half, so the 2x2-pool vertical sum is
    # a single contiguous half-split add afterwards.
    x = x_ref[...]                                               # (tb, 1024) bf16
    rows = [x[:, 32 * oy: 32 * oy + 160] for oy in range(28)]
    lhs1 = jnp.concatenate(rows[0::2] + rows[1::2], axis=0)      # (28*tb, 160)
    z1 = jnp.dot(lhs1, w1_ref[...], preferred_element_type=f32)  # (28*tb, 168)
    a1 = jnp.tanh(z1 + b1_ref[...])                              # f32 tanh (v5e-safe)
    # vertical pool-sum (0.25 + horizontal pairing are folded into w2 band),
    # cast to bf16 exactly once.
    p1 = (a1[:14 * tb] + a1[14 * tb:]).astype(bf16)              # (14*tb, 168)
    p1 = p1.reshape(14, tb, 168)

    # --- stage 2: Conv2d(6->16, k5) + Tanh, decomposed over the 5 vertical
    #     taps; each tap's LHS is a zero-copy leading-dim slice of p1 with
    #     M = 10*tb.  f32 accumulation across taps. ---
    acc2 = None
    for di in range(5):
        lhs = p1[di:di + 10].reshape(10 * tb, 168)
        t = jnp.dot(lhs, w2_ref[di], preferred_element_type=f32)  # (10*tb, 160)
        acc2 = t if acc2 is None else acc2 + t
    a2 = jnp.tanh(acc2 + b2_ref[...]).astype(bf16)                # (10*tb, 160)
    a2 = a2.reshape(10, tb, 160)

    # --- stage 3: (pool2 + flatten + fc1)-folded accumulating matmuls, then
    #     FC 120->84->10, all lane-padded to 128. ---
    fc1 = None
    for oy in range(10):
        t = jnp.dot(a2[oy], mf_ref[oy], preferred_element_type=f32)  # (tb, 128)
        fc1 = t if fc1 is None else fc1 + t
    h = jnp.tanh(fc1 + bf1_ref[...]).astype(bf16)                    # (tb, 128)
    h = jnp.tanh(jnp.dot(h, wf2_ref[...], preferred_element_type=f32)
                 + bf2_ref[...]).astype(bf16)                        # (tb, 128)
    out = jnp.dot(h, wf3_ref[...], preferred_element_type=f32) + bf3_ref[...]
    out_ref[...] = out.astype(out_ref.dtype)


# ----------------------------------------------------------------------------
# One-time parameter packing: banded / pool-folded MXU weight matrices.
# ----------------------------------------------------------------------------
def pack_params(params):
    f32, bf16 = jnp.float32, jnp.bfloat16
    w1, b1 = params["w1"].astype(f32), params["b1"].astype(f32)     # (6,1,5,5), (6,)
    w2, b2 = params["w2"].astype(f32), params["b2"].astype(f32)     # (16,6,5,5), (16,)
    wf1, bf1 = params["wf1"].astype(f32), params["bf1"].astype(f32) # (120,400), (120,)
    wf2, bf2 = params["wf2"].astype(f32), params["bf2"].astype(f32) # (84,120), (84,)
    wf3, bf3 = params["wf3"].astype(f32), params["bf3"].astype(f32) # (10,84), (10,)

    # conv1 band: rows = 5 stacked padded-input rows (5*32), cols = 28*6
    #   w1cat[di*32 + xin, ox*6 + co] = w1[co, 0, di, xin-ox]  (0 <= xin-ox <= 4)
    ox1 = np.arange(28)
    blocks = []
    for di in range(5):
        blk = jnp.zeros((32, 28, 6), f32)
        for dj in range(5):
            vals = jnp.broadcast_to(w1[:, 0, di, dj], (28, 6))
            blk = blk.at[ox1 + dj, ox1, :].set(vals)
        blocks.append(blk.reshape(32, 168))
    w1cat = jnp.concatenate(blocks, axis=0)                  # (160, 168)
    b1row = jnp.tile(b1, 28)[None, :]                        # (1, 168)

    # conv2 band split per vertical tap, with the preceding 2x2 AvgPool folded:
    #   w2band[di, x1*6 + ci, ox*16 + co] = 0.25 * w2[co, ci, di, x1//2 - ox]
    ox2 = np.arange(10)
    blocks = []
    for di in range(5):
        blk = jnp.zeros((28, 6, 10, 16), f32)
        for dj in range(5):
            vals = jnp.broadcast_to(0.25 * w2[:, :, di, dj].T, (10, 6, 16))
            for v in range(2):
                blk = blk.at[2 * (ox2 + dj) + v, :, ox2, :].set(vals)
        blocks.append(blk.reshape(168, 160))
    w2band = jnp.stack(blocks, axis=0)                       # (5, 168, 160)
    b2row = jnp.tile(b2, 10)[None, :]                        # (1, 160)

    # fc1 with the second 2x2 AvgPool and the NCHW flatten folded in:
    #   mfold[y, x*16 + c, n] = 0.25 * wf1[n, c*25 + (y//2)*5 + (x//2)]
    kidx = (np.arange(16)[None, None, :] * 25
            + (np.arange(10) // 2)[:, None, None] * 5
            + (np.arange(10) // 2)[None, :, None])           # (10, 10, 16)
    mfold = (0.25 * wf1.T[kidx, :]).reshape(10, 160, 120)
    mfold = jnp.pad(mfold, ((0, 0), (0, 0), (0, 8)))         # (10, 160, 128)
    bf1row = jnp.pad(bf1, (0, 8))[None, :]                   # (1, 128)

    wf2p = jnp.zeros((128, 128), f32).at[:120, :84].set(wf2.T)
    bf2row = jnp.pad(bf2, (0, 44))[None, :]
    wf3p = jnp.zeros((128, 128), f32).at[:84, :10].set(wf3.T)
    bf3row = jnp.pad(bf3, (0, 118))[None, :]

    return {
        "w1cat": w1cat.astype(bf16), "b1row": b1row,
        "w2band": w2band.astype(bf16), "b2row": b2row,
        "mfold": mfold.astype(bf16), "bf1row": bf1row,
        "wf2p": wf2p.astype(bf16), "bf2row": bf2row,
        "wf3p": wf3p.astype(bf16), "bf3row": bf3row,
    }


# ----------------------------------------------------------------------------
# Forward wrapper: one pallas_call for the whole network.
# ----------------------------------------------------------------------------
def lenet_forward(packed, x, *, batch_block=128):
    B = x.shape[0]
    assert x.shape[1:] == (1, 28, 28)

    # Pad the 28x28 image to 32x32 (Conv2d padding=2), flatten row-major and
    # store in bf16 (the MXU operand dtype) to halve the input DMA.
    xp = jnp.pad(x[:, 0].astype(jnp.bfloat16), ((0, 0), (2, 2), (2, 2)))
    xflat = xp.reshape(B, 32 * 32)                           # (B, 1024) bf16

    tb, bp = _pick_batch_tile(B, batch_block)
    if bp != B:
        xflat = jnp.pad(xflat, ((0, bp - B), (0, 0)))

    const2 = lambda i: (0, 0)
    const3 = lambda i: (0, 0, 0)
    flops_per_ex = (2 * 28 * 160 * 168 + 2 * 5 * 10 * 168 * 160
                    + 2 * 10 * 160 * 128 + 2 * 2 * 128 * 128)
    trans_per_ex = 28 * 168 + 10 * 160 + 2 * 128
    weight_bytes = 2 * (160 * 168 + 5 * 168 * 160 + 10 * 160 * 128 + 2 * 128 * 128)

    out = pl.pallas_call(
        _lenet_kernel,
        out_shape=jax.ShapeDtypeStruct((bp, 128), jnp.float32),
        grid=(bp // tb,),
        in_specs=[
            pl.BlockSpec((tb, 1024), lambda i: (i, 0)),        # padded input rows (bf16)
            pl.BlockSpec((160, 168), const2),                  # conv1 band (bf16)
            pl.BlockSpec((1, 168), const2),                    # conv1 bias row
            pl.BlockSpec((5, 168, 160), const3),               # conv2 band per-tap (bf16)
            pl.BlockSpec((1, 160), const2),                    # conv2 bias row
            pl.BlockSpec((10, 160, 128), const3),              # fc1 fold (bf16)
            pl.BlockSpec((1, 128), const2),                    # fc1 bias
            pl.BlockSpec((128, 128), const2),                  # fc2 weight (bf16)
            pl.BlockSpec((1, 128), const2),                    # fc2 bias
            pl.BlockSpec((128, 128), const2),                  # fc3 weight (bf16)
            pl.BlockSpec((1, 128), const2),                    # fc3 bias
        ],
        out_specs=pl.BlockSpec((tb, 128), lambda i: (i, 0)),
        compiler_params=pltpu.CompilerParams(
            dimension_semantics=("parallel",),
            vmem_limit_bytes=32 * 1024 * 1024),
        cost_estimate=pl.CostEstimate(
            flops=bp * flops_per_ex,
            transcendentals=bp * trans_per_ex,
            bytes_accessed=bp * (1024 * 2 + 128 * 4) + weight_bytes),
    )(xflat,
      packed["w1cat"], packed["b1row"],
      packed["w2band"], packed["b2row"],
      packed["mfold"], packed["bf1row"],
      packed["wf2p"], packed["bf2row"],
      packed["wf3p"], packed["bf3row"])

    return out[:B, :10]


# ----------------------------------------------------------------------------
# Pure-XLA f32 reference (PyTorch-equivalent semantics) and synthetic params.
# ----------------------------------------------------------------------------
def lenet_reference(params, x):
    hi = jax.lax.Precision.HIGHEST

    def conv(a, w, b, pad):
        out = jax.lax.conv_general_dilated(
            a, w, window_strides=(1, 1),
            padding=((pad, pad), (pad, pad)),
            dimension_numbers=("NCHW", "OIHW", "NCHW"),
            precision=hi)
        return out + b[None, :, None, None]

    def pool(a):
        return 0.25 * jax.lax.reduce_window(
            a, jnp.array(0.0, a.dtype), jax.lax.add,
            (1, 1, 2, 2), (1, 1, 2, 2), "VALID")

    a = pool(jnp.tanh(conv(x, params["w1"], params["b1"], 2)))
    a = pool(jnp.tanh(conv(a, params["w2"], params["b2"], 0)))
    a = a.reshape(x.shape[0], -1)
    a = jnp.tanh(jnp.dot(a, params["wf1"].T, precision=hi) + params["bf1"])
    a = jnp.tanh(jnp.dot(a, params["wf2"].T, precision=hi) + params["bf2"])
    return jnp.dot(a, params["wf3"].T, precision=hi) + params["bf3"]


def init_params(key):
    ks = jax.random.split(key, 10)
    s = 0.1
    return {
        "w1": jax.random.normal(ks[0], (6, 1, 5, 5), jnp.float32) * s,
        "b1": jax.random.normal(ks[1], (6,), jnp.float32) * s,
        "w2": jax.random.normal(ks[2], (16, 6, 5, 5), jnp.float32) * s,
        "b2": jax.random.normal(ks[3], (16,), jnp.float32) * s,
        "wf1": jax.random.normal(ks[4], (120, 16 * 5 * 5), jnp.float32) * s,
        "bf1": jax.random.normal(ks[5], (120,), jnp.float32) * s,
        "wf2": jax.random.normal(ks[6], (84, 120), jnp.float32) * s,
        "bf2": jax.random.normal(ks[7], (84,), jnp.float32) * s,
        "wf3": jax.random.normal(ks[8], (10, 84), jnp.float32) * s,
        "bf3": jax.random.normal(ks[9], (10,), jnp.float32) * s,
    }


if __name__ == "__main__":
    key = jax.random.PRNGKey(0)
    pkey, xkey = jax.random.split(key)
    params = init_params(pkey)
    packed = pack_params(params)                 # one-time weight packing

    # LeNet's 16*5*5 flatten implies 28x28 inputs; small batch of 2.
    x = jax.random.normal(xkey, (2, 1, 28, 28), jnp.float32)

    fwd = jax.jit(lenet_forward)
    out = jax.block_until_ready(fwd(packed, x))
    assert out.shape == (2, 10) and out.dtype == jnp.float32

    # Numerical check against the pure-XLA f32 reference (bf16 MXU operands
    # in the kernel -> loose tolerance).
    ref = jax.block_until_ready(lenet_reference(params, x))
    np.testing.assert_allclose(np.asarray(out), np.asarray(ref),
                               rtol=0.0, atol=7.5e-2)

    print("KERNEL_OK")
</pallas_src>

<mosaic_0001>
module attributes {stable_mosaic.version = 11 : i64} {
  func.func @_lenet_kernel(%arg0: i32, %arg1: memref<8x1024xbf16, #tpu.memory_space<vmem>>, %arg2: memref<160x168xbf16, #tpu.memory_space<vmem>>, %arg3: memref<1x168xf32, #tpu.memory_space<vmem>>, %arg4: memref<5x168x160xbf16, #tpu.memory_space<vmem>>, %arg5: memref<1x160xf32, #tpu.memory_space<vmem>>, %arg6: memref<10x160x128xbf16, #tpu.memory_space<vmem>>, %arg7: memref<1x128xf32, #tpu.memory_space<vmem>>, %arg8: memref<128x128xbf16, #tpu.memory_space<vmem>>, %arg9: memref<1x128xf32, #tpu.memory_space<vmem>>, %arg10: memref<128x128xbf16, #tpu.memory_space<vmem>>, %arg11: memref<1x128xf32, #tpu.memory_space<vmem>>, %arg12: memref<8x128xf32, #tpu.memory_space<vmem>>) attributes {dimension_semantics = [#tpu.dimension_semantics<parallel>], iteration_bounds = array<i64: 1>, scalar_prefetch = 0 : i64, scratch_operands = 0 : i64, tpu.core_type = #tpu.core_type<tc>, window_params = [{transform_indices = @transform_0, window_bounds = array<i64: 8, 1024>}, {pipeline_mode = #tpu.pipeline_mode<synchronous>, transform_indices = @transform_1, window_bounds = array<i64: 160, 168>}, {pipeline_mode = #tpu.pipeline_mode<synchronous>, transform_indices = @transform_2, window_bounds = array<i64: 1, 168>}, {pipeline_mode = #tpu.pipeline_mode<synchronous>, transform_indices = @transform_3, window_bounds = array<i64: 5, 168, 160>}, {pipeline_mode = #tpu.pipeline_mode<synchronous>, transform_indices = @transform_4, window_bounds = array<i64: 1, 160>}, {pipeline_mode = #tpu.pipeline_mode<synchronous>, transform_indices = @transform_5, window_bounds = array<i64: 10, 160, 128>}, {pipeline_mode = #tpu.pipeline_mode<synchronous>, transform_indices = @transform_6, window_bounds = array<i64: 1, 128>}, {pipeline_mode = #tpu.pipeline_mode<synchronous>, transform_indices = @transform_7, window_bounds = array<i64: 128, 128>}, {pipeline_mode = #tpu.pipeline_mode<synchronous>, transform_indices = @transform_8, window_bounds = array<i64: 1, 128>}, {pipeline_mode = #tpu.pipeline_mode<synchronous>, transform_indices = @transform_9, window_bounds = array<i64: 128, 128>}, {pipeline_mode = #tpu.pipeline_mode<synchronous>, transform_indices = @transform_10, window_bounds = array<i64: 1, 128>}, {transform_indices = @transform_11, window_bounds = array<i64: 8, 128>}]} {
    %c0 = arith.constant 0 : index
    %c0_0 = arith.constant 0 : index
    %0 = vector.load %arg1[%c0, %c0_0] : memref<8x1024xbf16, #tpu.memory_space<vmem>>, vector<8x1024xbf16>
    %1 = vector.extract_strided_slice %0 {offsets = [0, 0], sizes = [8, 160], strides = [1, 1]} : vector<8x1024xbf16> to vector<8x160xbf16>
    %2 = vector.extract_strided_slice %0 {offsets = [0, 32], sizes = [8, 160], strides = [1, 1]} : vector<8x1024xbf16> to vector<8x160xbf16>
    %3 = vector.extract_strided_slice %0 {offsets = [0, 64], sizes = [8, 160], strides = [1, 1]} : vector<8x1024xbf16> to vector<8x160xbf16>
    %4 = vector.extract_strided_slice %0 {offsets = [0, 96], sizes = [8, 160], strides = [1, 1]} : vector<8x1024xbf16> to vector<8x160xbf16>
    %5 = vector.extract_strided_slice %0 {offsets = [0, 128], sizes = [8, 160], strides = [1, 1]} : vector<8x1024xbf16> to vector<8x160xbf16>
    %6 = vector.extract_strided_slice %0 {offsets = [0, 160], sizes = [8, 160], strides = [1, 1]} : vector<8x1024xbf16> to vector<8x160xbf16>
    %7 = vector.extract_strided_slice %0 {offsets = [0, 192], sizes = [8, 160], strides = [1, 1]} : vector<8x1024xbf16> to vector<8x160xbf16>
    %8 = vector.extract_strided_slice %0 {offsets = [0, 224], sizes = [8, 160], strides = [1, 1]} : vector<8x1024xbf16> to vector<8x160xbf16>
    %9 = vector.extract_strided_slice %0 {offsets = [0, 256], sizes = [8, 160], strides = [1, 1]} : vector<8x1024xbf16> to vector<8x160xbf16>
    %10 = vector.extract_strided_slice %0 {offsets = [0, 288], sizes = [8, 160], strides = [1, 1]} : vector<8x1024xbf16> to vector<8x160xbf16>
    %11 = vector.extract_strided_slice %0 {offsets = [0, 320], sizes = [8, 160], strides = [1, 1]} : vector<8x1024xbf16> to vector<8x160xbf16>
    %12 = vector.extract_strided_slice %0 {offsets = [0, 352], sizes = [8, 160], strides = [1, 1]} : vector<8x1024xbf16> to vector<8x160xbf16>
    %13 = vector.extract_strided_slice %0 {offsets = [0, 384], sizes = [8, 160], strides = [1, 1]} : vector<8x1024xbf16> to vector<8x160xbf16>
    %14 = vector.extract_strided_slice %0 {offsets = [0, 416], sizes = [8, 160], strides = [1, 1]} : vector<8x1024xbf16> to vector<8x160xbf16>
    %15 = vector.extract_strided_slice %0 {offsets = [0, 448], sizes = [8, 160], strides = [1, 1]} : vector<8x1024xbf16> to vector<8x160xbf16>
    %16 = vector.extract_strided_slice %0 {offsets = [0, 480], sizes = [8, 160], strides = [1, 1]} : vector<8x1024xbf16> to vector<8x160xbf16>
    %17 = vector.extract_strided_slice %0 {offsets = [0, 512], sizes = [8, 160], strides = [1, 1]} : vector<8x1024xbf16> to vector<8x160xbf16>
    %18 = vector.extract_strided_slice %0 {offsets = [0, 544], sizes = [8, 160], strides = [1, 1]} : vector<8x1024xbf16> to vector<8x160xbf16>
    %19 = vector.extract_strided_slice %0 {offsets = [0, 576], sizes = [8, 160], strides = [1, 1]} : vector<8x1024xbf16> to vector<8x160xbf16>
    %20 = vector.extract_strided_slice %0 {offsets = [0, 608], sizes = [8, 160], strides = [1, 1]} : vector<8x1024xbf16> to vector<8x160xbf16>
    %21 = vector.extract_strided_slice %0 {offsets = [0, 640], sizes = [8, 160], strides = [1, 1]} : vector<8x1024xbf16> to vector<8x160xbf16>
    %22 = vector.extract_strided_slice %0 {offsets = [0, 672], sizes = [8, 160], strides = [1, 1]} : vector<8x1024xbf16> to vector<8x160xbf16>
    %23 = vector.extract_strided_slice %0 {offsets = [0, 704], sizes = [8, 160], strides = [1, 1]} : vector<8x1024xbf16> to vector<8x160xbf16>
    %24 = vector.extract_strided_slice %0 {offsets = [0, 736], sizes = [8, 160], strides = [1, 1]} : vector<8x1024xbf16> to vector<8x160xbf16>
    %25 = vector.extract_strided_slice %0 {offsets = [0, 768], sizes = [8, 160], strides = [1, 1]} : vector<8x1024xbf16> to vector<8x160xbf16>
    %26 = vector.extract_strided_slice %0 {offsets = [0, 800], sizes = [8, 160], strides = [1, 1]} : vector<8x1024xbf16> to vector<8x160xbf16>
    %27 = vector.extract_strided_slice %0 {offsets = [0, 832], sizes = [8, 160], strides = [1, 1]} : vector<8x1024xbf16> to vector<8x160xbf16>
    %28 = vector.extract_strided_slice %0 {offsets = [0, 864], sizes = [8, 160], strides = [1, 1]} : vector<8x1024xbf16> to vector<8x160xbf16>
    %29 = tpu.concatenate %1, %3, %5, %7, %9, %11, %13, %15, %17, %19, %21, %23, %25, %27, %2, %4 in 0 : vector<8x160xbf16>, vector<8x160xbf16>, vector<8x160xbf16>, vector<8x160xbf16>, vector<8x160xbf16>, vector<8x160xbf16>, vector<8x160xbf16>, vector<8x160xbf16>, vector<8x160xbf16>, vector<8x160xbf16>, vector<8x160xbf16>, vector<8x160xbf16>, vector<8x160xbf16>, vector<8x160xbf16>, vector<8x160xbf16>, vector<8x160xbf16> -> vector<128x160xbf16>
    %30 = tpu.concatenate %6, %8, %10, %12, %14, %16, %18, %20, %22, %24, %26, %28 in 0 : vector<8x160xbf16>, vector<8x160xbf16>, vector<8x160xbf16>, vector<8x160xbf16>, vector<8x160xbf16>, vector<8x160xbf16>, vector<8x160xbf16>, vector<8x160xbf16>, vector<8x160xbf16>, vector<8x160xbf16>, vector<8x160xbf16>, vector<8x160xbf16> -> vector<96x160xbf16>
    %31 = tpu.concatenate %29, %30 in 0 : vector<128x160xbf16>, vector<96x160xbf16> -> vector<224x160xbf16>
    %c0_1 = arith.constant 0 : index
    %c0_2 = arith.constant 0 : index
    %32 = vector.load %arg2[%c0_1, %c0_2] : memref<160x168xbf16, #tpu.memory_space<vmem>>, vector<160x168xbf16>
    %cst = arith.constant dense<0.000000e+00> : vector<224x168xf32>
    %33 = tpu.matmul %31, %32, %cst {dimension_numbers = #tpu.dot_dimension_numbers<[1], [0], [0], [1], [0, 0, 1, 1], [], []>} : vector<224x160xbf16>, vector<160x168xbf16>, vector<224x168xf32> -> vector<224x168xf32>
    %c0_3 = arith.constant 0 : index
    %c0_4 = arith.constant 0 : index
    %34 = vector.load %arg3[%c0_3, %c0_4] : memref<1x168xf32, #tpu.memory_space<vmem>>, vector<1x168xf32>
    %35 = vector.broadcast %34 : vector<1x168xf32> to vector<224x168xf32>
    %36 = arith.addf %33, %35 : vector<224x168xf32>
    %37 = math.tanh %36 : vector<224x168xf32>
    %38 = vector.extract_strided_slice %37 {offsets = [0, 0], sizes = [112, 168], strides = [1, 1]} : vector<224x168xf32> to vector<112x168xf32>
    %39 = vector.extract_strided_slice %37 {offsets = [112, 0], sizes = [112, 168], strides = [1, 1]} : vector<224x168xf32> to vector<112x168xf32>
    %40 = arith.addf %38, %39 : vector<112x168xf32>
    %41 = arith.truncf %40 : vector<112x168xf32> to vector<112x168xbf16>
    %42 = vector.shape_cast %41 : vector<112x168xbf16> to vector<14x8x168xbf16>
    %43 = vector.extract_strided_slice %42 {offsets = [0, 0, 0], sizes = [10, 8, 168], strides = [1, 1, 1]} : vector<14x8x168xbf16> to vector<10x8x168xbf16>
    %44 = vector.shape_cast %43 : vector<10x8x168xbf16> to vector<80x168xbf16>
    %c0_5 = arith.constant 0 : index
    %c0_6 = arith.constant 0 : index
    %c0_7 = arith.constant 0 : index
    %45 = vector.load %arg4[%c0_5, %c0_6, %c0_7] : memref<5x168x160xbf16, #tpu.memory_space<vmem>>, vector<1x168x160xbf16>
    %46 = vector.shape_cast %45 : vector<1x168x160xbf16> to vector<168x160xbf16>
    %cst_8 = arith.constant dense<0.000000e+00> : vector<80x160xf32>
    %47 = tpu.matmul %44, %46, %cst_8 {dimension_numbers = #tpu.dot_dimension_numbers<[1], [0], [0], [1], [0, 0, 1, 1], [], []>} : vector<80x168xbf16>, vector<168x160xbf16>, vector<80x160xf32> -> vector<80x160xf32>
    %48 = vector.extract_strided_slice %42 {offsets = [1, 0, 0], sizes = [10, 8, 168], strides = [1, 1, 1]} : vector<14x8x168xbf16> to vector<10x8x168xbf16>
    %49 = vector.shape_cast %48 : vector<10x8x168xbf16> to vector<80x168xbf16>
    %c1 = arith.constant 1 : index
    %c0_9 = arith.constant 0 : index
    %c0_10 = arith.constant 0 : index
    %50 = vector.load %arg4[%c1, %c0_9, %c0_10] : memref<5x168x160xbf16, #tpu.memory_space<vmem>>, vector<1x168x160xbf16>
    %51 = vector.shape_cast %50 : vector<1x168x160xbf16> to vector<168x160xbf16>
    %cst_11 = arith.constant dense<0.000000e+00> : vector<80x160xf32>
    %52 = tpu.matmul %49, %51, %cst_11 {dimension_numbers = #tpu.dot_dimension_numbers<[1], [0], [0], [1], [0, 0, 1, 1], [], []>} : vector<80x168xbf16>, vector<168x160xbf16>, vector<80x160xf32> -> vector<80x160xf32>
    %53 = arith.addf %47, %52 : vector<80x160xf32>
    %54 = vector.extract_strided_slice %42 {offsets = [2, 0, 0], sizes = [10, 8, 168], strides = [1, 1, 1]} : vector<14x8x168xbf16> to vector<10x8x168xbf16>
    %55 = vector.shape_cast %54 : vector<10x8x168xbf16> to vector<80x168xbf16>
    %c2 = arith.constant 2 : index
    %c0_12 = arith.constant 0 : index
    %c0_13 = arith.constant 0 : index
    %56 = vector.load %arg4[%c2, %c0_12, %c0_13] : memref<5x168x160xbf16, #tpu.memory_space<vmem>>, vector<1x168x160xbf16>
    %57 = vector.shape_cast %56 : vector<1x168x160xbf16> to vector<168x160xbf16>
    %cst_14 = arith.constant dense<0.000000e+00> : vector<80x160xf32>
    %58 = tpu.matmul %55, %57, %cst_14 {dimension_numbers = #tpu.dot_dimension_numbers<[1], [0], [0], [1], [0, 0, 1, 1], [], []>} : vector<80x168xbf16>, vector<168x160xbf16>, vector<80x160xf32> -> vector<80x160xf32>
    %59 = arith.addf %53, %58 : vector<80x160xf32>
    %60 = vector.extract_strided_slice %42 {offsets = [3, 0, 0], sizes = [10, 8, 168], strides = [1, 1, 1]} : vector<14x8x168xbf16> to vector<10x8x168xbf16>
    %61 = vector.shape_cast %60 : vector<10x8x168xbf16> to vector<80x168xbf16>
    %c3 = arith.constant 3 : index
    %c0_15 = arith.constant 0 : index
    %c0_16 = arith.constant 0 : index
    %62 = vector.load %arg4[%c3, %c0_15, %c0_16] : memref<5x168x160xbf16, #tpu.memory_space<vmem>>, vector<1x168x160xbf16>
    %63 = vector.shape_cast %62 : vector<1x168x160xbf16> to vector<168x160xbf16>
    %cst_17 = arith.constant dense<0.000000e+00> : vector<80x160xf32>
    %64 = tpu.matmul %61, %63, %cst_17 {dimension_numbers = #tpu.dot_dimension_numbers<[1], [0], [0], [1], [0, 0, 1, 1], [], []>} : vector<80x168xbf16>, vector<168x160xbf16>, vector<80x160xf32> -> vector<80x160xf32>
    %65 = arith.addf %59, %64 : vector<80x160xf32>
    %66 = vector.extract_strided_slice %42 {offsets = [4, 0, 0], sizes = [10, 8, 168], strides = [1, 1, 1]} : vector<14x8x168xbf16> to vector<10x8x168xbf16>
    %67 = vector.shape_cast %66 : vector<10x8x168xbf16> to vector<80x168xbf16>
    %c4 = arith.constant 4 : index
    %c0_18 = arith.constant 0 : index
    %c0_19 = arith.constant 0 : index
    %68 = vector.load %arg4[%c4, %c0_18, %c0_19] : memref<5x168x160xbf16, #tpu.memory_space<vmem>>, vector<1x168x160xbf16>
    %69 = vector.shape_cast %68 : vector<1x168x160xbf16> to vector<168x160xbf16>
    %cst_20 = arith.constant dense<0.000000e+00> : vector<80x160xf32>
    %70 = tpu.matmul %67, %69, %cst_20 {dimension_numbers = #tpu.dot_dimension_numbers<[1], [0], [0], [1], [0, 0, 1, 1], [], []>} : vector<80x168xbf16>, vector<168x160xbf16>, vector<80x160xf32> -> vector<80x160xf32>
    %71 = arith.addf %65, %70 : vector<80x160xf32>
    %c0_21 = arith.constant 0 : index
    %c0_22 = arith.constant 0 : index
    %72 = vector.load %arg5[%c0_21, %c0_22] : memref<1x160xf32, #tpu.memory_space<vmem>>, vector<1x160xf32>
    %73 = vector.broadcast %72 : vector<1x160xf32> to vector<80x160xf32>
    %74 = arith.addf %71, %73 : vector<80x160xf32>
    %75 = math.tanh %74 : vector<80x160xf32>
    %76 = arith.truncf %75 : vector<80x160xf32> to vector<80x160xbf16>
    %77 = vector.shape_cast %76 : vector<80x160xbf16> to vector<10x8x160xbf16>
    %78 = vector.extract_strided_slice %77 {offsets = [0, 0, 0], sizes = [1, 8, 160], strides = [1, 1, 1]} : vector<10x8x160xbf16> to vector<1x8x160xbf16>
    %79 = vector.shape_cast %78 : vector<1x8x160xbf16> to vector<8x160xbf16>
    %c0_23 = arith.constant 0 : index
    %c0_24 = arith.constant 0 : index
    %c0_25 = arith.constant 0 : index
    %80 = vector.load %arg6[%c0_23, %c0_24, %c0_25] : memref<10x160x128xbf16, #tpu.memory_space<vmem>>, vector<1x160x128xbf16>
    %81 = vector.shape_cast %80 : vector<1x160x128xbf16> to vector<160x128xbf16>
    %cst_26 = arith.constant dense<0.000000e+00> : vector<8x128xf32>
    %82 = tpu.matmul %79, %81, %cst_26 {dimension_numbers = #tpu.dot_dimension_numbers<[1], [0], [0], [1], [0, 0, 1, 1], [], []>} : vector<8x160xbf16>, vector<160x128xbf16>, vector<8x128xf32> -> vector<8x128xf32>
    %83 = vector.extract_strided_slice %77 {offsets = [1, 0, 0], sizes = [1, 8, 160], strides = [1, 1, 1]} : vector<10x8x160xbf16> to vector<1x8x160xbf16>
    %84 = vector.shape_cast %83 : vector<1x8x160xbf16> to vector<8x160xbf16>
    %c1_27 = arith.constant 1 : index
    %c0_28 = arith.constant 0 : index
    %c0_29 = arith.constant 0 : index
    %85 = vector.load %arg6[%c1_27, %c0_28, %c0_29] : memref<10x160x128xbf16, #tpu.memory_space<vmem>>, vector<1x160x128xbf16>
    %86 = vector.shape_cast %85 : vector<1x160x128xbf16> to vector<160x128xbf16>
    %cst_30 = arith.constant dense<0.000000e+00> : vector<8x128xf32>
    %87 = tpu.matmul %84, %86, %cst_30 {dimension_numbers = #tpu.dot_dimension_numbers<[1], [0], [0], [1], [0, 0, 1, 1], [], []>} : vector<8x160xbf16>, vector<160x128xbf16>, vector<8x128xf32> -> vector<8x128xf32>
    %88 = arith.addf %82, %87 : vector<8x128xf32>
    %89 = vector.extract_strided_slice %77 {offsets = [2, 0, 0], sizes = [1, 8, 160], strides = [1, 1, 1]} : vector<10x8x160xbf16> to vector<1x8x160xbf16>
    %90 = vector.shape_cast %89 : vector<1x8x160xbf16> to vector<8x160xbf16>
    %c2_31 = arith.constant 2 : index
    %c0_32 = arith.constant 0 : index
    %c0_33 = arith.constant 0 : index
    %91 = vector.load %arg6[%c2_31, %c0_32, %c0_33] : memref<10x160x128xbf16, #tpu.memory_space<vmem>>, vector<1x160x128xbf16>
    %92 = vector.shape_cast %91 : vector<1x160x128xbf16> to vector<160x128xbf16>
    %cst_34 = arith.constant dense<0.000000e+00> : vector<8x128xf32>
    %93 = tpu.matmul %90, %92, %cst_34 {dimension_numbers = #tpu.dot_dimension_numbers<[1], [0], [0], [1], [0, 0, 1, 1], [], []>} : vector<8x160xbf16>, vector<160x128xbf16>, vector<8x128xf32> -> vector<8x128xf32>
    %94 = arith.addf %88, %93 : vector<8x128xf32>
    %95 = vector.extract_strided_slice %77 {offsets = [3, 0, 0], sizes = [1, 8, 160], strides = [1, 1, 1]} : vector<10x8x160xbf16> to vector<1x8x160xbf16>
    %96 = vector.shape_cast %95 : vector<1x8x160xbf16> to vector<8x160xbf16>
    %c3_35 = arith.constant 3 : index
    %c0_36 = arith.constant 0 : index
    %c0_37 = arith.constant 0 : index
    %97 = vector.load %arg6[%c3_35, %c0_36, %c0_37] : memref<10x160x128xbf16, #tpu.memory_space<vmem>>, vector<1x160x128xbf16>
    %98 = vector.shape_cast %97 : vector<1x160x128xbf16> to vector<160x128xbf16>
    %cst_38 = arith.constant dense<0.000000e+00> : vector<8x128xf32>
    %99 = tpu.matmul %96, %98, %cst_38 {dimension_numbers = #tpu.dot_dimension_numbers<[1], [0], [0], [1], [0, 0, 1, 1], [], []>} : vector<8x160xbf16>, vector<160x128xbf16>, vector<8x128xf32> -> vector<8x128xf32>
    %100 = arith.addf %94, %99 : vector<8x128xf32>
    %101 = vector.extract_strided_slice %77 {offsets = [4, 0, 0], sizes = [1, 8, 160], strides = [1, 1, 1]} : vector<10x8x160xbf16> to vector<1x8x160xbf16>
    %102 = vector.shape_cast %101 : vector<1x8x160xbf16> to vector<8x160xbf16>
    %c4_39 = arith.constant 4 : index
    %c0_40 = arith.constant 0 : index
    %c0_41 = arith.constant 0 : index
    %103 = vector.load %arg6[%c4_39, %c0_40, %c0_41] : memref<10x160x128xbf16, #tpu.memory_space<vmem>>, vector<1x160x128xbf16>
    %104 = vector.shape_cast %103 : vector<1x160x128xbf16> to vector<160x128xbf16>
    %cst_42 = arith.constant dense<0.000000e+00> : vector<8x128xf32>
    %105 = tpu.matmul %102, %104, %cst_42 {dimension_numbers = #tpu.dot_dimension_numbers<[1], [0], [0], [1], [0, 0, 1, 1], [], []>} : vector<8x160xbf16>, vector<160x128xbf16>, vector<8x128xf32> -> vector<8x128xf32>
    %106 = arith.addf %100, %105 : vector<8x128xf32>
    %107 = vector.extract_strided_slice %77 {offsets = [5, 0, 0], sizes = [1, 8, 160], strides = [1, 1, 1]} : vector<10x8x160xbf16> to vector<1x8x160xbf16>
    %108 = vector.shape_cast %107 : vector<1x8x160xbf16> to vector<8x160xbf16>
    %c5 = arith.constant 5 : index
    %c0_43 = arith.constant 0 : index
    %c0_44 = arith.constant 0 : index
    %109 = vector.load %arg6[%c5, %c0_43, %c0_44] : memref<10x160x128xbf16, #tpu.memory_space<vmem>>, vector<1x160x128xbf16>
    %110 = vector.shape_cast %109 : vector<1x160x128xbf16> to vector<160x128xbf16>
    %cst_45 = arith.constant dense<0.000000e+00> : vector<8x128xf32>
    %111 = tpu.matmul %108, %110, %cst_45 {dimension_numbers = #tpu.dot_dimension_numbers<[1], [0], [0], [1], [0, 0, 1, 1], [], []>} : vector<8x160xbf16>, vector<160x128xbf16>, vector<8x128xf32> -> vector<8x128xf32>
    %112 = arith.addf %106, %111 : vector<8x128xf32>
    %113 = vector.extract_strided_slice %77 {offsets = [6, 0, 0], sizes = [1, 8, 160], strides = [1, 1, 1]} : vector<10x8x160xbf16> to vector<1x8x160xbf16>
    %114 = vector.shape_cast %113 : vector<1x8x160xbf16> to vector<8x160xbf16>
    %c6 = arith.constant 6 : index
    %c0_46 = arith.constant 0 : index
    %c0_47 = arith.constant 0 : index
    %115 = vector.load %arg6[%c6, %c0_46, %c0_47] : memref<10x160x128xbf16, #tpu.memory_space<vmem>>, vector<1x160x128xbf16>
    %116 = vector.shape_cast %115 : vector<1x160x128xbf16> to vector<160x128xbf16>
    %cst_48 = arith.constant dense<0.000000e+00> : vector<8x128xf32>
    %117 = tpu.matmul %114, %116, %cst_48 {dimension_numbers = #tpu.dot_dimension_numbers<[1], [0], [0], [1], [0, 0, 1, 1], [], []>} : vector<8x160xbf16>, vector<160x128xbf16>, vector<8x128xf32> -> vector<8x128xf32>
    %118 = arith.addf %112, %117 : vector<8x128xf32>
    %119 = vector.extract_strided_slice %77 {offsets = [7, 0, 0], sizes = [1, 8, 160], strides = [1, 1, 1]} : vector<10x8x160xbf16> to vector<1x8x160xbf16>
    %120 = vector.shape_cast %119 : vector<1x8x160xbf16> to vector<8x160xbf16>
    %c7 = arith.constant 7 : index
    %c0_49 = arith.constant 0 : index
    %c0_50 = arith.constant 0 : index
    %121 = vector.load %arg6[%c7, %c0_49, %c0_50] : memref<10x160x128xbf16, #tpu.memory_space<vmem>>, vector<1x160x128xbf16>
    %122 = vector.shape_cast %121 : vector<1x160x128xbf16> to vector<160x128xbf16>
    %cst_51 = arith.constant dense<0.000000e+00> : vector<8x128xf32>
    %123 = tpu.matmul %120, %122, %cst_51 {dimension_numbers = #tpu.dot_dimension_numbers<[1], [0], [0], [1], [0, 0, 1, 1], [], []>} : vector<8x160xbf16>, vector<160x128xbf16>, vector<8x128xf32> -> vector<8x128xf32>
    %124 = arith.addf %118, %123 : vector<8x128xf32>
    %125 = vector.extract_strided_slice %77 {offsets = [8, 0, 0], sizes = [1, 8, 160], strides = [1, 1, 1]} : vector<10x8x160xbf16> to vector<1x8x160xbf16>
    %126 = vector.shape_cast %125 : vector<1x8x160xbf16> to vector<8x160xbf16>
    %c8 = arith.constant 8 : index
    %c0_52 = arith.constant 0 : index
    %c0_53 = arith.constant 0 : index
    %127 = vector.load %arg6[%c8, %c0_52, %c0_53] : memref<10x160x128xbf16, #tpu.memory_space<vmem>>, vector<1x160x128xbf16>
    %128 = vector.shape_cast %127 : vector<1x160x128xbf16> to vector<160x128xbf16>
    %cst_54 = arith.constant dense<0.000000e+00> : vector<8x128xf32>
    %129 = tpu.matmul %126, %128, %cst_54 {dimension_numbers = #tpu.dot_dimension_numbers<[1], [0], [0], [1], [0, 0, 1, 1], [], []>} : vector<8x160xbf16>, vector<160x128xbf16>, vector<8x128xf32> -> vector<8x128xf32>
    %130 = arith.addf %124, %129 : vector<8x128xf32>
    %131 = vector.extract_strided_slice %77 {offsets = [9, 0, 0], sizes = [1, 8, 160], strides = [1, 1, 1]} : vector<10x8x160xbf16> to vector<1x8x160xbf16>
    %132 = vector.shape_cast %131 : vector<1x8x160xbf16> to vector<8x160xbf16>
    %c9 = arith.constant 9 : index
    %c0_55 = arith.constant 0 : index
    %c0_56 = arith.constant 0 : index
    %133 = vector.load %arg6[%c9, %c0_55, %c0_56] : memref<10x160x128xbf16, #tpu.memory_space<vmem>>, vector<1x160x128xbf16>
    %134 = vector.shape_cast %133 : vector<1x160x128xbf16> to vector<160x128xbf16>
    %cst_57 = arith.constant dense<0.000000e+00> : vector<8x128xf32>
    %135 = tpu.matmul %132, %134, %cst_57 {dimension_numbers = #tpu.dot_dimension_numbers<[1], [0], [0], [1], [0, 0, 1, 1], [], []>} : vector<8x160xbf16>, vector<160x128xbf16>, vector<8x128xf32> -> vector<8x128xf32>
    %136 = arith.addf %130, %135 : vector<8x128xf32>
    %c0_58 = arith.constant 0 : index
    %c0_59 = arith.constant 0 : index
    %137 = vector.load %arg7[%c0_58, %c0_59] : memref<1x128xf32, #tpu.memory_space<vmem>>, vector<1x128xf32>
    %138 = vector.broadcast %137 : vector<1x128xf32> to vector<8x128xf32>
    %139 = arith.addf %136, %138 : vector<8x128xf32>
    %140 = math.tanh %139 : vector<8x128xf32>
    %141 = arith.truncf %140 : vector<8x128xf32> to vector<8x128xbf16>
    %c0_60 = arith.constant 0 : index
    %c0_61 = arith.constant 0 : index
    %142 = vector.load %arg8[%c0_60, %c0_61] : memref<128x128xbf16, #tpu.memory_space<vmem>>, vector<128x128xbf16>
    %cst_62 = arith.constant dense<0.000000e+00> : vector<8x128xf32>
    %143 = tpu.matmul %141, %142, %cst_62 {dimension_numbers = #tpu.dot_dimension_numbers<[1], [0], [0], [1], [0, 0, 1, 1], [], []>} : vector<8x128xbf16>, vector<128x128xbf16>, vector<8x128xf32> -> vector<8x128xf32>
    %c0_63 = arith.constant 0 : index
    %c0_64 = arith.constant 0 : index
    %144 = vector.load %arg9[%c0_63, %c0_64] : memref<1x128xf32, #tpu.memory_space<vmem>>, vector<1x128xf32>
    %145 = vector.broadcast %144 : vector<1x128xf32> to vector<8x128xf32>
    %146 = arith.addf %143, %145 : vector<8x128xf32>
    %147 = math.tanh %146 : vector<8x128xf32>
    %148 = arith.truncf %147 : vector<8x128xf32> to vector<8x128xbf16>
    %c0_65 = arith.constant 0 : index
    %c0_66 = arith.constant 0 : index
    %149 = vector.load %arg10[%c0_65, %c0_66] : memref<128x128xbf16, #tpu.memory_space<vmem>>, vector<128x128xbf16>
    %cst_67 = arith.constant dense<0.000000e+00> : vector<8x128xf32>
    %150 = tpu.matmul %148, %149, %cst_67 {dimension_numbers = #tpu.dot_dimension_numbers<[1], [0], [0], [1], [0, 0, 1, 1], [], []>} : vector<8x128xbf16>, vector<128x128xbf16>, vector<8x128xf32> -> vector<8x128xf32>
    %c0_68 = arith.constant 0 : index
    %c0_69 = arith.constant 0 : index
    %151 = vector.load %arg11[%c0_68, %c0_69] : memref<1x128xf32, #tpu.memory_space<vmem>>, vector<1x128xf32>
    %152 = vector.broadcast %151 : vector<1x128xf32> to vector<8x128xf32>
    %153 = arith.addf %150, %152 : vector<8x128xf32>
    %c0_70 = arith.constant 0 : index
    %c0_71 = arith.constant 0 : index
    %154 = vector.load %arg12[%c0_70, %c0_71] : memref<8x128xf32, #tpu.memory_space<vmem>>, vector<8x128xf32>
    tpu.vector_store %arg12[%c0_70, %c0_71], %153 {strides = array<i32>} : memref<8x128xf32, #tpu.memory_space<vmem>>, vector<8x128xf32>,
    return
  }
  func.func @transform_0(%arg0: i32) -> (i32, i32) {
    %c0_i32 = arith.constant 0 : i32
    %c0_i32_0 = arith.constant 0 : i32
    return %arg0, %c0_i32 : i32, i32
  }
  func.func @transform_1(%arg0: i32) -> (i32, i32) {
    %c0_i32 = arith.constant 0 : i32
    %c0_i32_0 = arith.constant 0 : i32
    %c0_i32_1 = arith.constant 0 : i32
    return %c0_i32, %c0_i32_0 : i32, i32
  }
  func.func @transform_2(%arg0: i32) -> (i32, i32) {
    %c0_i32 = arith.constant 0 : i32
    %c0_i32_0 = arith.constant 0 : i32
    %c0_i32_1 = arith.constant 0 : i32
    return %c0_i32, %c0_i32_0 : i32, i32
  }
  func.func @transform_3(%arg0: i32) -> (i32, i32, i32) {
    %c0_i32 = arith.constant 0 : i32
    %c0_i32_0 = arith.constant 0 : i32
    %c0_i32_1 = arith.constant 0 : i32
    %c0_i32_2 = arith.constant 0 : i32
    return %c0_i32, %c0_i32_0, %c0_i32_1 : i32, i32, i32
  }
  func.func @transform_4(%arg0: i32) -> (i32, i32) {
    %c0_i32 = arith.constant 0 : i32
    %c0_i32_0 = arith.constant 0 : i32
    %c0_i32_1 = arith.constant 0 : i32
    return %c0_i32, %c0_i32_0 : i32, i32
  }
  func.func @transform_5(%arg0: i32) -> (i32, i32, i32) {
    %c0_i32 = arith.constant 0 : i32
    %c0_i32_0 = arith.constant 0 : i32
    %c0_i32_1 = arith.constant 0 : i32
    %c0_i32_2 = arith.constant 0 : i32
    return %c0_i32, %c0_i32_0, %c0_i32_1 : i32, i32, i32
  }
  func.func @transform_6(%arg0: i32) -> (i32, i32) {
    %c0_i32 = arith.constant 0 : i32
    %c0_i32_0 = arith.constant 0 : i32
    %c0_i32_1 = arith.constant 0 : i32
    return %c0_i32, %c0_i32_0 : i32, i32
  }
  func.func @transform_7(%arg0: i32) -> (i32, i32) {
    %c0_i32 = arith.constant 0 : i32
    %c0_i32_0 = arith.constant 0 : i32
    %c0_i32_1 = arith.constant 0 : i32
    return %c0_i32, %c0_i32_0 : i32, i32
  }
  func.func @transform_8(%arg0: i32) -> (i32, i32) {
    %c0_i32 = arith.constant 0 : i32
    %c0_i32_0 = arith.constant 0 : i32
    %c0_i32_1 = arith.constant 0 : i32
    return %c0_i32, %c0_i32_0 : i32, i32
  }
  func.func @transform_9(%arg0: i32) -> (i32, i32) {
    %c0_i32 = arith.constant 0 : i32
    %c0_i32_0 = arith.constant 0 : i32
    %c0_i32_1 = arith.constant 0 : i32
    return %c0_i32, %c0_i32_0 : i32, i32
  }
  func.func @transform_10(%arg0: i32) -> (i32, i32) {
    %c0_i32 = arith.constant 0 : i32
    %c0_i32_0 = arith.constant 0 : i32
    %c0_i32_1 = arith.constant 0 : i32
    return %c0_i32, %c0_i32_0 : i32, i32
  }
  func.func @transform_11(%arg0: i32) -> (i32, i32) {
    %c0_i32 = arith.constant 0 : i32
    %c0_i32_0 = arith.constant 0 : i32
    return %arg0, %c0_i32 : i32, i32
  }
}

</mosaic_0001>

<bundles_post_ra>
// kernel: lenet_forward.1
= control target key start
LH: loop header
LB: loop body
LE: loop exit
PB: predicated region body
PF: predicated region fallthrough
CT: control target
= control target key end

     0   :  { %s4757_s25 = smov 64   ;;  %s4758_s29 = smov 96   ;;  %vm52_vm0 = vcmask 523264   ;;  %vm99_vm1 = vcmask 1043456   ;;  %vm97_vm2 = vcmask 261120   ;;  %vm91_vm3 = vcmask 785408   ;;  %s6179_s0 = inlined_call_operand.vmem [shape: bf16[8,1024], index: 0, kind: input, shape index: {}]   ;;  %s6180_s1 = inlined_call_operand.vmem [shape: bf16[160,168], index: 1, kind: input, shape index: {}]   ;;  %s6181_s3 = inlined_call_operand.vmem [shape: bf16[5,168,160], index: 3, kind: input, shape index: {}]   ;;  %s6182_s2 = inlined_call_operand.vmem [shape: f32[1,168], index: 2, kind: input, shape index: {}]   ;;  %s6183_s5 = inlined_call_operand.vmem [shape: bf16[10,160,128], index: 5, kind: input, shape index: {}]   ;;  %s6184_s4 = inlined_call_operand.vmem [shape: f32[1,160], index: 4, kind: input, shape index: {}]   ;;  %s6185_s7 = inlined_call_operand.vmem [shape: bf16[128,128], index: 7, kind: input, shape index: {}]   ;;  %s6186_s9 = inlined_call_operand.vmem [shape: bf16[128,128], index: 9, kind: input, shape index: {}]   ;;  %s6187_s6 = inlined_call_operand.vmem [shape: f32[1,128], index: 6, kind: input, shape index: {}]   ;;  %s6188_s8 = inlined_call_operand.vmem [shape: f32[1,128], index: 8, kind: input, shape index: {}]   ;;  %s6189_s10 = inlined_call_operand.vmem [shape: f32[1,128], index: 10, kind: input, shape index: {}]   ;;  %s6190_s11 = inlined_call_operand.vmem [shape: f32[8,128], index: 11, kind: output, shape index: {}]  }
   0x1   :  { %v39_v0 = vld [vmem:[%s6179_s0] sm:$0xff]  ;;  %v40_v1 = vld [vmem:[%s6179_s0 + $0x8] sm:$0xff]  ;;  %v4298_v8 = vld [vmem:[%s6180_s1 + $0x14] ss:$8 sps:$4 sm:$0xff]   ;;  %s4759_s14 = smov 32   ;;  %vm865_vm4 = vcmask 326656  }
   0x2   :  { %v4829_v2 = vcombine.low %v39_v0, %v39_v0  ;;  %v4831_v3 = vcombine.low %v40_v1, %v40_v1  ;;  %v4295_v4 = vld [vmem:[%s6180_s1 + $0x4] ss:$8 sps:$4 sm:$0xff]   ;;  %v4297_v5 = vld [vmem:[%s6180_s1] ss:$8 sps:$4 sm:$0xff]   ;;  %v4839_v6 = vcombine.high %v39_v0, %v39_v0  ;;  %v4843_v7 = vcombine.high %v40_v1, %v40_v1  ;;  %v41_v9 = vld [vmem:[%s6179_s0 + $0x10] sm:$0xff] }
   0x3   :  { %389 = vmatprep.subr.bf16.mxu0 %v4295_v4  ;;  %v4300_v10 = vld [vmem:[%s6180_s1 + $0x10] ss:$8 sps:$4 sm:$0xff]   ;;  %v4301_v11 = vld [vmem:[%s6180_s1 + $0x24] ss:$8 sps:$4 sm:$0xff]   ;;  %v4859_v12 = vcombine.low %v41_v9, %v41_v9  ;;  %v4861_v13 = vcombine.high %v41_v9, %v41_v9  ;;  %v4303_v15 = vld [vmem:[%s6180_s1 + $0x20] ss:$8 sps:$4 sm:$0xff]  }
   0x4   :  { %48 = vrot.lane.b32.xlu0 %v4829_v2, %s4757_s25  ;;  %57 = vrot.lane.b32.xlu1 %v4831_v3, %s4757_s25  ;;  %v42_v14 = vld [vmem:[%s6179_s0 + $0x18] sm:$0xff]  ;;  %v4307_v20 = vld [vmem:[%s6180_s1 + $0x44] ss:$8 sps:$4 sm:$0xff]   ;;  %vm4762_vm5 = vmmov 0  }
   0x5   :  { %390 = vmatpush1.bf16.msra.mxu0 %v4297_v5  ;;  %v4304_v16 = vld [vmem:[%s6180_s1 + $0x34] ss:$8 sps:$4 sm:$0xff]   ;;  %v4874_v17 = vcombine.low %v42_v14, %v42_v14  ;;  %v4876_v18 = vcombine.high %v42_v14, %v42_v14  ;;  %v4306_v19 = vld [vmem:[%s6180_s1 + $0x30] ss:$8 sps:$4 sm:$0xff]   ;;  %v4309_v21 = vld [vmem:[%s6180_s1 + $0x40] ss:$8 sps:$4 sm:$0xff]  }
   0x6   :  { %391 = vmatprep.subr.bf16.mxu0 %v4298_v8  ;;  %v4310_v22 = vld [vmem:[%s6180_s1 + $0x54] ss:$8 sps:$4 sm:$0xff]   ;;  %v4312_v23 = vld [vmem:[%s6180_s1 + $0x50] ss:$8 sps:$4 sm:$0xff]   ;;  %v4313_v24 = vld [vmem:[%s6180_s1 + $0x64] ss:$8 sps:$4 sm:$0xff]  }
   0x7   :  { %v4315_v25 = vld [vmem:[%s6180_s1 + $0x60] ss:$8 sps:$4 sm:$0xff]   ;;  %v4316_v26 = vld [vmem:[%s6180_s1 + $0x74] ss:$8 sps:$4 sm:$0xff]   ;;  %v4318_v27 = vld [vmem:[%s6180_s1 + $0x70] ss:$8 sps:$4 sm:$0xff]  }
   0x8   :  { %50 = vrot.lane.b32.xlu0 %v4839_v6, %s4757_s25  ;;  %62 = vrot.lane.b32.xlu1 %v4843_v7, %s4757_s25  ;;  %v4319_v28 = vld [vmem:[%s6180_s1 + $0x84] ss:$8 sps:$4 sm:$0xff]   ;;  %v4321_v29 = vld [vmem:[%s6180_s1 + $0x80] ss:$8 sps:$4 sm:$0xff]  }
   0x9   :  { %392 = vmatpush1.bf16.msra.mxu0 %v4300_v10  ;;  %v4322_v30 = vld [vmem:[%s6180_s1 + $0x94] ss:$8 sps:$4 sm:$0xff]   ;;  %v4324_v31 = vld [vmem:[%s6180_s1 + $0x90] ss:$8 sps:$4 sm:$0xff]  }
   0xa   :  { %393 = vmatprep.subr.bf16.mxu0 %v4301_v11 }
   0xc   :  { %68 = vrot.lane.b32.xlu0 %v4859_v12, %s4757_s25  ;;  %73 = vrot.lane.b32.xlu1 %v4861_v13, %s4757_s25 }
   0xd   :  { %394 = vmatpush1.bf16.msra.mxu0 %v4303_v15 }
   0xe   :  { %395 = vmatprep.subr.bf16.mxu0 %v4304_v16 }
  0x10   :  { %79 = vrot.lane.b32.xlu0 %v4874_v17, %s4757_s25  ;;  %84 = vrot.lane.b32.xlu1 %v4876_v18, %s4757_s25 }
  0x11   :  { %396 = vmatpush1.bf16.msra.mxu0 %v4306_v19 }
  0x12   :  { %397 = vmatprep.subr.bf16.mxu0 %v4307_v20 }
  0x14   :  { %89 = vrot.lane.b32.xlu1 %v4839_v6, %s4758_s29  ;;  %87 = vrot.lane.b32.xlu0 %v4829_v2, %s4758_s29 }
  0x15   :  { %398 = vmatpush1.bf16.msra.mxu0 %v4309_v21 }
  0x16   :  { %399 = vmatprep.subr.bf16.mxu0 %v4310_v22 }
  0x18   :  { %95 = vrot.lane.b32.xlu1 %v4839_v6, %s4759_s14  ;;  %93 = vrot.lane.b32.xlu0 %v4829_v2, %s4759_s14 }
  0x19   :  { %400 = vmatpush1.bf16.msra.mxu0 %v4312_v23 }
  0x1a   :  { %401 = vmatprep.subr.bf16.mxu0 %v4313_v24 }
  0x1c   :  { %153 = vrot.lane.b32.xlu1 %v4831_v3, %s4759_s14  ;;  %150 = vrot.lane.b32.xlu0 %v4831_v3, %s4758_s29 }
  0x1d   :  { %402 = vmatpush1.bf16.msra.mxu0 %v4315_v25 }
  0x1e   :  { %403 = vmatprep.subr.bf16.mxu0 %v4316_v26 }
  0x20   :  { %159 = vrot.lane.b32.xlu1 %v4843_v7, %s4759_s14  ;;  %156 = vrot.lane.b32.xlu0 %v4843_v7, %s4758_s29 }
  0x21   :  { %404 = vmatpush1.bf16.msra.mxu0 %v4318_v27 }
  0x22   :  { %405 = vmatprep.subr.bf16.mxu0 %v4319_v28 }
  0x24   :  { %165 = vrot.lane.b32.xlu1 %v4859_v12, %s4759_s14  ;;  %162 = vrot.lane.b32.xlu0 %v4859_v12, %s4758_s29 }
  0x25   :  { %406 = vmatpush1.bf16.msra.mxu0 %v4321_v29 }
  0x26   :  { %407 = vmatprep.subr.bf16.mxu0 %v4322_v30 }
  0x28   :  { %171 = vrot.lane.b32.xlu1 %v4861_v13, %s4759_s14  ;;  %168 = vrot.lane.b32.xlu0 %v4861_v13, %s4758_s29 }
  0x29   :  { %408 = vmatpush1.bf16.msra.mxu0 %v4324_v31 }
  0x2c   :  { %177 = vrot.lane.b32.xlu1 %v4874_v17, %s4759_s14  ;;  %174 = vrot.lane.b32.xlu0 %v4874_v17, %s4758_s29 }
  0x30   :  { %183 = vrot.lane.b32.xlu1 %v4876_v18, %s4759_s14  ;;  %180 = vrot.lane.b32.xlu0 %v4876_v18, %s4758_s29 }
  0x76   :  { %v49_v32 = vpop.permute.xlu0 %48  ;;  %v58_v33 = vpop.permute.xlu1 %57 }
  0x77   :  { %v112_v37 = vsel %vm99_vm1, %v4831_v3, %v58_v33 }
  0x7a   :  { %v51_v34 = vpop.permute.xlu0 %50  ;;  %v63_v40 = vpop.permute.xlu1 %62 }
  0x7b   :  { %v53_v35 = vsel %vm52_vm0, %v49_v32, %v51_v34  ;;  %v106_v36 = vsel %vm99_vm1, %v4839_v6, %v51_v34  ;;  %v59_v39 = vsel %vm52_vm0, %v51_v34, %v58_v33  ;;  %v118_v41 = vsel %vm99_vm1, %v4843_v7, %v63_v40 }
  0x7c   :  { %3556 = vmatprep.mubr.msk.bf16.mxu0 %vm97_vm2, %v106_v36  ;;  %v102_v38 = vsel %vm99_vm1, %v4829_v2, %v53_v35  ;;  %v108_v42 = vsel %vm99_vm1, %v4839_v6, %v59_v39  ;;  %v64_v43 = vsel %vm52_vm0, %v58_v33, %v63_v40 }
  0x7d   :  { %422 = vmatmul.mubr.bf16.vlgmr.msra.gmra.mrb[0].mxu0 %v102_v38  ;;  %v114_v46 = vsel %vm99_vm1, %v4831_v3, %v64_v43  ;;  %v4328_v43 = vld [vmem:[%s6181_s3 + $0xbc] ss:$8 sps:$4 sm:$0xff]  }
  0x7e   :  { %3557 = vmatprep.mubr.msk.bf16.mxu0 %vm97_vm2, %v112_v37  ;;  %v69_v44 = vpop.permute.xlu0 %68  ;;  %v74_v48 = vpop.permute.xlu1 %73 }
  0x7f   :  { %v124_v45 = vsel %vm99_vm1, %v4859_v12, %v69_v44  ;;  %v70_v47 = vsel %vm52_vm0, %v63_v40, %v69_v44  ;;  %v130_v49 = vsel %vm99_vm1, %v4861_v13, %v74_v48  ;;  %v75_v51 = vsel %vm52_vm0, %v69_v44, %v74_v48  ;;  %v4330_v44 = vld [vmem:[%s6181_s3 + $0xb8] ss:$8 sps:$4 sm:$0xff]  }
  0x80   :  { %v120_v50 = vsel %vm99_vm1, %v4843_v7, %v70_v47  ;;  %v126_v54 = vsel %vm99_vm1, %v4859_v12, %v75_v51  ;;  %v4334_v47 = vld [vmem:[%s6181_s3 + $0xdc] ss:$8 sps:$4 sm:$0xff]  }
  0x81   :  { %v4340_v51 = vld [vmem:[%s6181_s3 + $0xfc] ss:$8 sps:$4 sm:$0xff]  }
  0x82   :  { %v80_v52 = vpop.permute.xlu0 %79  ;;  %v85_v55 = vpop.permute.xlu1 %84 }
  0x83   :  { %v136_v53 = vsel %vm99_vm1, %v4874_v17, %v80_v52  ;;  %v81_v56 = vsel %vm52_vm0, %v74_v48, %v80_v52  ;;  %v142_v57 = vsel %vm99_vm1, %v4876_v18, %v85_v55  ;;  %v86_v61 = vsel %vm52_vm0, %v80_v52, %v85_v55  ;;  %v4336_v48 = vld [vmem:[%s6181_s3 + $0xd8] ss:$8 sps:$4 sm:$0xff]   ;;  %v4346_v55 = vld [vmem:[%s6181_s3 + $0x11c] ss:$8 sps:$4 sm:$0xff]  }
  0x84   :  { %v132_v58 = vsel %vm99_vm1, %v4861_v13, %v81_v56  ;;  %v138_v1 = vsel %vm99_vm1, %v4874_v17, %v86_v61  ;;  %v4342_v52 = vld [vmem:[%s6181_s3 + $0xf8] ss:$8 sps:$4 sm:$0xff]   ;;  %v3590_v61 = vld [vmem:[%s6181_s3 + $0x148] sm:$0xff] }
  0x85   :  { %432 = vmatmul.mubr.bf16.gmra.mrb[4].mxu0 %v108_v42  ;;  %v4327_v42 = vld [vmem:[%s6181_s3 + $0xa8] ss:$8 sps:$4 sm:$0xff]   ;;  %v4348_v56 = vld [vmem:[%s6181_s3 + $0x118] ss:$8 sps:$4 sm:$0xff]  }
  0x86   :  { %3558 = vmatprep.mubr.msk.bf16.mxu0 %vm97_vm2, %v118_v41  ;;  %v90_v59 = vpop.permute.xlu1 %89  ;;  %v88_v60 = vpop.permute.xlu0 %87  ;;  %v4325_v41 = vld [vmem:[%s6181_s3 + $0xac] ss:$8 sps:$4 sm:$0xff]  }
  0x87   :  { %v92_v2 = vsel %vm91_vm3, %v88_v60, %v90_v59  ;;  %887 = vmatprep.subr.bf16.mxu1 %v4325_v41  ;;  %v4354_v60 = vld [vmem:[%s6181_s3 + $0x138] ss:$8 sps:$4 sm:$0xff]  }
  0x88   :  { %888 = vmatpush1.bf16.msra.mxu1 %v4327_v42 }
  0x89   :  { %889 = vmatprep.subr.bf16.mxu1 %v4328_v43 }
  0x8a   :  { %v96_v62 = vpop.permute.xlu1 %95  ;;  %v94_v0 = vpop.permute.xlu0 %93 }
  0x8b   :  { %v149_v63 = vsel %vm99_vm1, %v90_v59, %v96_v62  ;;  %v98_v3 = vsel %vm97_vm2, %v94_v0, %v96_v62 }
  0x8c   :  { %v145_v7 = vsel %vm99_vm1, %v92_v2, %v98_v3  ;;  %890 = vmatpush1.bf16.msra.mxu1 %v4330_v44 }
  0x8d   :  { %442 = vmatmul.mubr.bf16.gmra.mrb[8].mxu0 %v114_v46  ;;  %v4333_v46 = vld [vmem:[%s6181_s3 + $0xc8] ss:$8 sps:$4 sm:$0xff]  }
  0x8e   :  { %3559 = vmatprep.mubr.msk.bf16.mxu0 %vm97_vm2, %v124_v45  ;;  %v154_v4 = vpop.permute.xlu1 %153  ;;  %v151_v5 = vpop.permute.xlu0 %150  ;;  %v4331_v45 = vld [vmem:[%s6181_s3 + $0xcc] ss:$8 sps:$4 sm:$0xff]  }
  0x8f   :  { %v192_v6 = vsel %vm99_vm1, %v151_v5, %v154_v4  ;;  %v155_v8 = vsel %vm97_vm2, %v96_v62, %v154_v4  ;;  %v152_v9 = vsel %vm91_vm3, %v90_v59, %v151_v5  ;;  %891 = vmatprep.subr.bf16.mxu1 %v4331_v45  ;;  %v4352_v59 = vld [vmem:[%s6181_s3 + $0x13c] ss:$8 sps:$4 sm:$0xff]   ;;  %v3612_v62 = vcombine.high %v3590_v61, %v3590_v61 }
  0x90   :  { %v188_v13 = vsel %vm99_vm1, %v152_v9, %v155_v8  ;;  %892 = vmatpush1.bf16.msra.mxu1 %v4333_v46 }
  0x91   :  { %893 = vmatprep.subr.bf16.mxu1 %v4334_v47 }
  0x92   :  { %v160_v10 = vpop.permute.xlu1 %159  ;;  %v157_v11 = vpop.permute.xlu0 %156 }
  0x93   :  { %v199_v12 = vsel %vm99_vm1, %v157_v11, %v160_v10  ;;  %v161_v14 = vsel %vm97_vm2, %v154_v4, %v160_v10  ;;  %v158_v15 = vsel %vm91_vm3, %v151_v5, %v157_v11 }
  0x94   :  { %v195_v19 = vsel %vm99_vm1, %v158_v15, %v161_v14  ;;  %894 = vmatpush1.bf16.msra.mxu1 %v4336_v48 }
  0x95   :  { %452 = vmatmul.mubr.bf16.gmra.mrb[12].mxu0 %v120_v50  ;;  %v4339_v50 = vld [vmem:[%s6181_s3 + $0xe8] ss:$8 sps:$4 sm:$0xff]  }
  0x96   :  { %3560 = vmatprep.mubr.msk.bf16.mxu0 %vm97_vm2, %v130_v49  ;;  %v166_v16 = vpop.permute.xlu1 %165  ;;  %v163_v17 = vpop.permute.xlu0 %162  ;;  %v4337_v49 = vld [vmem:[%s6181_s3 + $0xec] ss:$8 sps:$4 sm:$0xff]  }
  0x97   :  { %v206_v18 = vsel %vm99_vm1, %v163_v17, %v166_v16  ;;  %v167_v20 = vsel %vm97_vm2, %v160_v10, %v166_v16  ;;  %v164_v21 = vsel %vm91_vm3, %v157_v11, %v163_v17  ;;  %895 = vmatprep.subr.bf16.mxu1 %v4337_v49 }
  0x98   :  { %v202_v25 = vsel %vm99_vm1, %v164_v21, %v167_v20  ;;  %896 = vmatpush1.bf16.msra.mxu1 %v4339_v50  ;;  %v250_v21 = vlaneseq }
  0x99   :  { %897 = vmatprep.subr.bf16.mxu1 %v4340_v51 }
  0x9a   :  { %v172_v22 = vpop.permute.xlu1 %171  ;;  %v169_v23 = vpop.permute.xlu0 %168 }
  0x9b   :  { %v213_v24 = vsel %vm99_vm1, %v169_v23, %v172_v22  ;;  %v173_v26 = vsel %vm97_vm2, %v166_v16, %v172_v22  ;;  %v170_v27 = vsel %vm91_vm3, %v163_v17, %v169_v23 }
  0x9c   :  { %v209_v31 = vsel %vm99_vm1, %v170_v27, %v173_v26  ;;  %898 = vmatpush1.bf16.msra.mxu1 %v4342_v52 }
  0x9d   :  { %462 = vmatmul.mubr.bf16.gmra.mrb[16].mxu0 %v126_v54  ;;  %v4345_v54 = vld [vmem:[%s6181_s3 + $0x108] ss:$8 sps:$4 sm:$0xff]  }
  0x9e   :  { %3561 = vmatprep.mubr.msk.bf16.mxu0 %vm97_vm2, %v136_v53  ;;  %v178_v28 = vpop.permute.xlu1 %177  ;;  %v175_v29 = vpop.permute.xlu0 %174  ;;  %v4343_v53 = vld [vmem:[%s6181_s3 + $0x10c] ss:$8 sps:$4 sm:$0xff]  }
  0x9f   :  { %v220_v30 = vsel %vm99_vm1, %v175_v29, %v178_v28  ;;  %v179_v32 = vsel %vm97_vm2, %v172_v22, %v178_v28  ;;  %v176_v33 = vsel %vm91_vm3, %v169_v23, %v175_v29  ;;  %899 = vmatprep.subr.bf16.mxu1 %v4343_v53  ;;  %v5112_v23 = vshrl.u32 %v250_v21, 7 }
  0xa0   :  { %v216_v37 = vsel %vm99_vm1, %v176_v33, %v179_v32  ;;  %900 = vmatpush1.bf16.msra.mxu1 %v4345_v54 }
  0xa1   :  { %901 = vmatprep.subr.bf16.mxu1 %v4346_v55  ;;  %v252_v27 = vsub.s32 0, %v5112_v23 }
  0xa2   :  { %v184_v34 = vpop.permute.xlu1 %183  ;;  %v181_v35 = vpop.permute.xlu0 %180 }
  0xa3   :  { %v227_v36 = vsel %vm99_vm1, %v181_v35, %v184_v34  ;;  %v185_v38 = vsel %vm97_vm2, %v178_v28, %v184_v34  ;;  %v182_v39 = vsel %vm91_vm3, %v175_v29, %v181_v35  ;;  %v248_v29 = vld [vmem:[%s6182_s2] sm:$0x3] }
  0xa4   :  { %v223_v40 = vsel %vm99_vm1, %v182_v39, %v185_v38  ;;  %902 = vmatpush1.bf16.msra.mxu1 %v4348_v56 }
  0xa5   :  { %472 = vmatmul.mubr.bf16.gmra.mrb[20].mxu0 %v132_v58  ;;  %v4351_v58 = vld [vmem:[%s6181_s3 + $0x128] ss:$8 sps:$4 sm:$0xff]  }
  0xa6   :  { %3562 = vmatprep.mubr.msk.bf16.mxu0 %vm97_vm2, %v142_v57  ;;  %v4349_v57 = vld [vmem:[%s6181_s3 + $0x12c] ss:$8 sps:$4 sm:$0xff]  }
  0xa7   :  { %903 = vmatprep.subr.bf16.mxu1 %v4349_v57 }
  0xa8   :  { %904 = vmatpush1.bf16.msra.mxu1 %v4351_v58 }
  0xa9   :  { %905 = vmatprep.subr.bf16.mxu1 %v4352_v59 }
  0xac   :  { %906 = vmatpush1.bf16.msra.mxu1 %v4354_v60 }
  0xad   :  { %482 = vmatmul.mubr.bf16.gmra.mrb[24].mxu0 %v138_v1  ;;  %3613 = vmatprep.subr.msk.bf16.mxu1 %vm99_vm1, %v3612_v62  ;;  %v4359_v1 = vld [vmem:[%s6181_s3 + $0x4] ss:$8 sps:$4 sm:$0xff]  }
  0xae   :  { %3563 = vmatprep.mubr.msk.bf16.mxu0 %vm97_vm2, %v149_v63  ;;  %v3611_v63 = vcombine.low %v3590_v61, %v3590_v61 }
  0xb0   :  { %v882_v0 = vsel %vm99_vm1, %v3611_v63, 0 }
  0xb1   :  { %908 = vmatpush1.bf16.msra.mxu1 %v882_v0 }
  0xb2   :  { %1111 = vmatprep.subr.bf16.mxu1 %v4359_v1 }
  0xb5   :  { %492 = vmatmul.mubr.bf16.gmra.mrb[28].mxu0 %v145_v7 }
  0xb6   :  { %3564 = vmatprep.mubr.msk.bf16.mxu0 %vm97_vm2, %v192_v6 }
  0xbd   :  { %502 = vmatmul.mubr.bf16.gmra.mrb[32].mxu0 %v188_v13 }
  0xbe   :  { %3565 = vmatprep.mubr.msk.bf16.mxu0 %vm97_vm2, %v199_v12 }
  0xc5   :  { %512 = vmatmul.mubr.bf16.gmra.mrb[36].mxu0 %v195_v19 }
  0xc6   :  { %3566 = vmatprep.mubr.msk.bf16.mxu0 %vm97_vm2, %v206_v18 }
  0xcd   :  { %522 = vmatmul.mubr.bf16.gmra.mrb[40].mxu0 %v202_v25 }
  0xce   :  { %3567 = vmatprep.mubr.msk.bf16.mxu0 %vm97_vm2, %v213_v24 }
  0xd5   :  { %532 = vmatmul.mubr.bf16.gmra.mrb[44].mxu0 %v209_v31  ;;  %v5129_v31 = vrot.slane %v248_v29, %v252_v27 }
  0xd6   :  { %3568 = vmatprep.mubr.msk.bf16.mxu0 %vm97_vm2, %v220_v30  ;;  %v256_v30 = vsub.s32 1, %v5112_v23 }
  0xd8   :  { %v5133_v32 = vrot.slane %v248_v29, %v256_v30 }
  0xdd   :  { %542 = vmatmul.mubr.bf16.gmra.mrb[48].mxu0 %v216_v37 }
  0xde   :  { %3569 = vmatprep.mubr.msk.bf16.mxu0 %vm97_vm2, %v227_v36 }
  0xe5   :  { %552 = vmatmul.mubr.bf16.gmra.mrb[52].mxu0 %v223_v40 }
 0x150   :  { %v423_v2 = vpop.f32.mrb[0].mxu0 }
 0x151   :  { %v425_v3 = vpop.f32.mrb[1].mxu0  ;;  %v424_v36 = vadd.f32 %v423_v2, %v5129_v31 }
 0x152   :  { %v427_v4 = vpop.f32.mrb[2].mxu0  ;;  %v426_v38 = vadd.f32 %v425_v3, %v5133_v32 }
 0x153   :  { %v429_v5 = vpop.f32.mrb[3].mxu0  ;;  %v428_v39 = vadd.f32 %v427_v4, %v5129_v31  ;;  %4601 = vtanh.f32 %v424_v36 }
 0x154   :  { %v430_v40 = vadd.f32 %v429_v5, %v5133_v32  ;;  %4603 = vtanh.f32 %v426_v38 }
 0x155   :  { %4605 = vtanh.f32 %v428_v39 }
 0x156   :  { %4607 = vtanh.f32 %v430_v40 }
 0x158   :  { %v433_v6 = vpop.f32.mrb[4].mxu0 }
 0x159   :  { %v435_v7 = vpop.f32.mrb[5].mxu0  ;;  %v434_v46 = vadd.f32 %v433_v6, %v5129_v31 }
 0x15a   :  { %v437_v8 = vpop.f32.mrb[6].mxu0  ;;  %v436_v49 = vadd.f32 %v435_v7, %v5133_v32 }
 0x15b   :  { %v439_v9 = vpop.f32.mrb[7].mxu0  ;;  %v438_v51 = vadd.f32 %v437_v8, %v5129_v31 }
 0x15c   :  { %v440_v52 = vadd.f32 %v439_v9, %v5133_v32 }
 0x15d   :  { %v4602_v54 = vpop.eup %4601 }
 0x15e   :  { %v4604_v57 = vpop.eup %4603 }
 0x15f   :  { %v4606_v60 = vpop.eup %4605 }
 0x160   :  { %v5088_v10 = vpop.f32.mrb[8].mxu0  ;;  %v4608_v0 = vpop.eup %4607 }
 0x161   :  { %v5090_v11 = vpop.f32.mrb[9].mxu0  ;;  %v444_v61 = vadd.f32 %v5088_v10, %v5129_v31 }
 0x162   :  { %v5092_v12 = vpop.f32.mrb[10].mxu0  ;;  %v446_v1 = vadd.f32 %v5090_v11, %v5133_v32 }
 0x163   :  { %v5094_v13 = vpop.f32.mrb[11].mxu0  ;;  %v448_v4 = vadd.f32 %v5092_v12, %v5129_v31 }
 0x164   :  { %v450_v6 = vadd.f32 %v5094_v13, %v5133_v32 }
 0x168   :  { %v5096_v14 = vpop.f32.mrb[12].mxu0 }
 0x169   :  { %v5098_v15 = vpop.f32.mrb[13].mxu0 }
 0x16a   :  { %v5100_v16 = vpop.f32.mrb[14].mxu0 }
 0x16b   :  { %v5102_v17 = vpop.f32.mrb[15].mxu0 }
 0x170   :  { %v5104_v18 = vpop.f32.mrb[16].mxu0 }
 0x171   :  { %v5106_v19 = vpop.f32.mrb[17].mxu0 }
 0x172   :  { %v5108_v20 = vpop.f32.mrb[18].mxu0 }
 0x173   :  { %v5110_v22 = vpop.f32.mrb[19].mxu0 }
 0x178   :  { %v5114_v24 = vpop.f32.mrb[20].mxu0 }
 0x179   :  { %v5116_v25 = vpop.f32.mrb[21].mxu0 }
 0x17a   :  { %v5118_v26 = vpop.f32.mrb[22].mxu0 }
 0x17b   :  { %v5121_v28 = vpop.f32.mrb[23].mxu0 }
 0x180   :  { %v5135_v33 = vpop.f32.mrb[24].mxu0 }
 0x181   :  { %v5137_v34 = vpop.f32.mrb[25].mxu0 }
 0x182   :  { %v5139_v35 = vpop.f32.mrb[26].mxu0 }
 0x183   :  { %v5142_v37 = vpop.f32.mrb[27].mxu0 }
 0x188   :  { %v493_v41 = vpop.f32.mrb[28].mxu0 }
 0x189   :  { %v494_v42 = vadd.f32 %v493_v41, %v5129_v31  ;;  %v495_v43 = vpop.f32.mrb[29].mxu0 }
 0x18a   :  { %v496_v44 = vadd.f32 %v495_v43, %v5133_v32  ;;  %v497_v45 = vpop.f32.mrb[30].mxu0  ;;  %v454_v43 = vadd.f32 %v5096_v14, %v5129_v31  ;;  %v460_v14 = vadd.f32 %v5102_v17, %v5133_v32 }
 0x18b   :  { %4609 = vtanh.f32 %v494_v42  ;;  %v498_v47 = vadd.f32 %v497_v45, %v5129_v31  ;;  %v499_v48 = vpop.f32.mrb[31].mxu0 }
 0x18c   :  { %4611 = vtanh.f32 %v496_v44  ;;  %v500_v50 = vadd.f32 %v499_v48, %v5133_v32  ;;  %v456_v48 = vadd.f32 %v5098_v15, %v5133_v32 }
 0x18d   :  { %4613 = vtanh.f32 %v498_v47 }
 0x18e   :  { %4615 = vtanh.f32 %v500_v50 }
 0x18f   :  { %4617 = vtanh.f32 %v434_v46 }
 0x190   :  { %4619 = vtanh.f32 %v436_v49  ;;  %v503_v53 = vpop.f32.mrb[32].mxu0 }
 0x191   :  { %4621 = vtanh.f32 %v438_v51  ;;  %v504_v55 = vadd.f32 %v503_v53, %v5129_v31  ;;  %v505_v56 = vpop.f32.mrb[33].mxu0  ;;  %v458_v51 = vadd.f32 %v5100_v16, %v5129_v31 }
 0x192   :  { %4623 = vtanh.f32 %v440_v52  ;;  %v506_v58 = vadd.f32 %v505_v56, %v5133_v32  ;;  %v507_v59 = vpop.f32.mrb[34].mxu0 }
 0x193   :  { %4625 = vtanh.f32 %v504_v55  ;;  %v508_v62 = vadd.f32 %v507_v59, %v5129_v31  ;;  %v509_v63 = vpop.f32.mrb[35].mxu0 }
 0x194   :  { %4627 = vtanh.f32 %v506_v58  ;;  %v510_v2 = vadd.f32 %v509_v63, %v5133_v32 }
 0x195   :  { %v4610_v3 = vpop.eup %4609  ;;  %4629 = vtanh.f32 %v508_v62 }
 0x196   :  { %v4612_v5 = vpop.eup %4611  ;;  %4631 = vtanh.f32 %v510_v2  ;;  %v618_v7 = vadd.f32 %v4610_v3, %v4602_v54 }
 0x197   :  { %v4614_v8 = vpop.eup %4613  ;;  %4633 = vtanh.f32 %v444_v61  ;;  %v619_v9 = vadd.f32 %v4612_v5, %v4604_v57 }
 0x198   :  { %v4616_v10 = vpop.eup %4615  ;;  %4635 = vtanh.f32 %v446_v1  ;;  %v513_v11 = vpop.f32.mrb[36].mxu0  ;;  %v620_v21 = vadd.f32 %v4614_v8, %v4606_v60  ;;  %v464_v1 = vadd.f32 %v5104_v18, %v5129_v31 }
 0x199   :  { %v4618_v29 = vpop.eup %4617  ;;  %4637 = vtanh.f32 %v448_v4  ;;  %v514_v36 = vadd.f32 %v513_v11, %v5129_v31  ;;  %v515_v38 = vpop.f32.mrb[37].mxu0  ;;  %v621_v12 = vadd.f32 %v4616_v10, %v4608_v0  ;;  %v468_v10 = vadd.f32 %v5108_v20, %v5129_v31  ;;  %v4357_v20 = vld [vmem:[%s6181_s3] ss:$8 sps:$4 sm:$0xff]  }
 0x19a   :  { %v4620_v39 = vpop.eup %4619  ;;  %4639 = vtanh.f32 %v450_v6  ;;  %v516_v40 = vadd.f32 %v515_v38, %v5133_v32  ;;  %v517_v13 = vpop.f32.mrb[38].mxu0  ;;  %v5169_v41 = vpack.c.bf16 %v620_v21, %v618_v7  ;;  %v466_v6 = vadd.f32 %v5106_v19, %v5133_v32 }
 0x19b   :  { %v4622_v42 = vpop.eup %4621  ;;  %4641 = vtanh.f32 %v514_v36  ;;  %v518_v44 = vadd.f32 %v517_v13, %v5129_v31  ;;  %v519_v45 = vpop.f32.mrb[39].mxu0  ;;  %v5174_v46 = vpack.c.bf16 %v621_v12, %v619_v9 }
 0x19c   :  { %v4624_v47 = vpop.eup %4623  ;;  %4643 = vtanh.f32 %v516_v40  ;;  %v520_v49 = vadd.f32 %v519_v45, %v5133_v32  ;;  %v676_v19 = vunpack.c.h.b16 %v5169_v41 }
 0x19d   :  { %v4626_v50 = vpop.eup %4625  ;;  %4645 = vtanh.f32 %v518_v44  ;;  %v677_v18 = vunpack.c.h.b16 %v5174_v46 }
 0x19e   :  { %v4628_v52 = vpop.eup %4627  ;;  %v622_v53 = vadd.f32 %v4626_v50, %v4618_v29  ;;  %4647 = vtanh.f32 %v520_v49  ;;  %v470_v29 = vadd.f32 %v5110_v22, %v5133_v32  ;;  %v4362_v22 = vld [vmem:[%s6181_s3 + $0x14] ss:$8 sps:$4 sm:$0xff]  }
 0x19f   :  { %v4630_v54 = vpop.eup %4629  ;;  %4649 = vtanh.f32 %v454_v43  ;;  %v623_v55 = vadd.f32 %v4628_v52, %v4620_v39 }
 0x1a0   :  { %v4632_v56 = vpop.eup %4631  ;;  %4651 = vtanh.f32 %v456_v48  ;;  %v624_v15 = vadd.f32 %v4630_v54, %v4622_v42  ;;  %v523_v57 = vpop.f32.mrb[40].mxu0 }
 0x1a1   :  { %v4634_v58 = vpop.eup %4633  ;;  %4653 = vtanh.f32 %v458_v51  ;;  %v625_v59 = vadd.f32 %v4632_v56, %v4624_v47  ;;  %v524_v60 = vadd.f32 %v523_v57, %v5129_v31  ;;  %v525_v16 = vpop.f32.mrb[41].mxu0 }
 0x1a2   :  { %v4636_v61 = vpop.eup %4635  ;;  %4655 = vtanh.f32 %v460_v14  ;;  %v526_v62 = vadd.f32 %v525_v16, %v5133_v32  ;;  %v527_v17 = vpop.f32.mrb[42].mxu0  ;;  %v5185_v63 = vpack.c.bf16 %v624_v15, %v622_v53  ;;  %v474_v53 = vadd.f32 %v5114_v24, %v5129_v31  ;;  %v4360_v15 = vld [vmem:[%s6181_s3 + $0x10] ss:$8 sps:$4 sm:$0xff]   ;;  %v4365_v24 = vld [vmem:[%s6181_s3 + $0x24] ss:$8 sps:$4 sm:$0xff]  }
 0x1a3   :  { %v4638_v0 = vpop.eup %4637  ;;  %4657 = vtanh.f32 %v524_v60  ;;  %v528_v2 = vadd.f32 %v527_v17, %v5129_v31  ;;  %v529_v3 = vpop.f32.mrb[43].mxu0  ;;  %v5190_v4 = vpack.c.bf16 %v625_v59, %v623_v55 }
 0x1a4   :  { %v4640_v5 = vpop.eup %4639  ;;  %4659 = vtanh.f32 %v526_v62  ;;  %v530_v7 = vadd.f32 %v529_v3, %v5133_v32  ;;  %v678_v8 = vunpack.c.l.b16 %v5185_v63 }
 0x1a5   :  { %v4642_v9 = vpop.eup %4641  ;;  %4661 = vtanh.f32 %v528_v2  ;;  %v679_v11 = vunpack.c.l.b16 %v5190_v4  ;;  %v681_v62 = vunpack.c.h.b16 %v5190_v4  ;;  %v680_v2 = vunpack.c.h.b16 %v5185_v63 }
 0x1a6   :  { %v4644_v21 = vpop.eup %4643  ;;  %v626_v36 = vadd.f32 %v4642_v9, %v4634_v58  ;;  %4663 = vtanh.f32 %v530_v7  ;;  %v745_v43 = vpack.c.b16 %v678_v8, %v676_v19  ;;  %v476_v58 = vadd.f32 %v5116_v25, %v5133_v32 }
 0x1a7   :  { %v4646_v38 = vpop.eup %4645  ;;  %4665 = vtanh.f32 %v464_v1  ;;  %v627_v12 = vadd.f32 %v4644_v21, %v4636_v61  ;;  %v746_v39 = vpack.c.b16 %v679_v11, %v677_v18  ;;  %v478_v61 = vadd.f32 %v5118_v26, %v5129_v31  ;;  %v4363_v26 = vld [vmem:[%s6181_s3 + $0x20] ss:$8 sps:$4 sm:$0xff]  }
 0x1a8   :  { %v4648_v40 = vpop.eup %4647  ;;  %4667 = vtanh.f32 %v466_v6  ;;  %v628_v13 = vadd.f32 %v4646_v38, %v4638_v0  ;;  %v533_v42 = vpop.f32.mrb[44].mxu0  ;;  %v480_v0 = vadd.f32 %v5121_v28, %v5133_v32 }
 0x1a9   :  { %v4650_v44 = vpop.eup %4649  ;;  %4669 = vtanh.f32 %v468_v10  ;;  %v629_v45 = vadd.f32 %v4648_v40, %v4640_v5  ;;  %v534_v47 = vadd.f32 %v533_v42, %v5129_v31  ;;  %v535_v48 = vpop.f32.mrb[45].mxu0  ;;  %3614 = vmatprep.mubr.msk.bf16.mxu1 %vm865_vm4, %v746_v39  ;;  %v4368_v10 = vld [vmem:[%s6181_s3 + $0x34] ss:$8 sps:$4 sm:$0xff]  }
 0x1aa   :  { %v4652_v49 = vpop.eup %4651  ;;  %4671 = vtanh.f32 %v470_v29  ;;  %v5211_v50 = vpack.c.bf16 %v628_v13, %v626_v36  ;;  %v536_v51 = vadd.f32 %v535_v48, %v5133_v32  ;;  %v537_v52 = vpop.f32.mrb[46].mxu0  ;;  %920 = vmatmul.mubr.bf16.vlgmr.msra.gmra.mrb[0].mxu1 %v745_v43  ;;  %v4366_v43 = vld [vmem:[%s6181_s3 + $0x30] ss:$8 sps:$4 sm:$0xff]  }
 0x1ab   :  { %v4654_v14 = vpop.eup %4653  ;;  %v5216_v54 = vpack.c.bf16 %v629_v45, %v627_v12  ;;  %4673 = vtanh.f32 %v534_v47  ;;  %v538_v55 = vadd.f32 %v537_v52, %v5129_v31  ;;  %1112 = vmatpush1.bf16.msra.mxu1 %v4357_v20  ;;  %v539_v56 = vpop.f32.mrb[47].mxu0  ;;  %v484_v20 = vadd.f32 %v5135_v33, %v5129_v31  ;;  %v4371_v33 = vld [vmem:[%s6181_s3 + $0x44] ss:$8 sps:$4 sm:$0xff]  }
 0x1ac   :  { %v4656_v57 = vpop.eup %4655  ;;  %4675 = vtanh.f32 %v536_v51  ;;  %v540_v59 = vadd.f32 %v539_v56, %v5133_v32  ;;  %1113 = vmatprep.subr.bf16.mxu1 %v4362_v22  ;;  %v682_v60 = vunpack.c.l.b16 %v5211_v50 }
 0x1ad   :  { %v4658_v16 = vpop.eup %4657  ;;  %4677 = vtanh.f32 %v538_v55  ;;  %v683_v17 = vunpack.c.l.b16 %v5216_v54  ;;  %v685_v51 = vunpack.c.h.b16 %v5216_v54  ;;  %v684_v55 = vunpack.c.h.b16 %v5211_v50 }
 0x1ae   :  { %v4660_v25 = vpop.eup %4659  ;;  %v630_v1 = vadd.f32 %v4658_v16, %v4650_v44  ;;  %4679 = vtanh.f32 %v540_v59  ;;  %v5241_v28 = vpack.c.b16 %v682_v60, %v680_v2  ;;  %v486_v44 = vadd.f32 %v5137_v34, %v5133_v32  ;;  %v4374_v60 = vld [vmem:[%s6181_s3 + $0x54] ss:$8 sps:$4 sm:$0xff]  }
 0x1af   :  { %v4662_v3 = vpop.eup %4661  ;;  %4681 = vtanh.f32 %v474_v53  ;;  %v631_v5 = vadd.f32 %v4660_v25, %v4652_v49  ;;  %1114 = vmatpush1.bf16.msra.mxu1 %v4360_v15  ;;  %v5236_v6 = vpack.c.b16 %v683_v17, %v681_v62  ;;  %v488_v49 = vadd.f32 %v5139_v35, %v5129_v31  ;;  %v4369_v35 = vld [vmem:[%s6181_s3 + $0x40] ss:$8 sps:$4 sm:$0xff]  }
 0x1b0   :  { %v4664_v7 = vpop.eup %4663  ;;  %4683 = vtanh.f32 %v476_v58  ;;  %v632_v8 = vadd.f32 %v4662_v3, %v4654_v14  ;;  %v543_v9 = vpop.f32.mrb[48].mxu0  ;;  %1115 = vmatprep.subr.bf16.mxu1 %v4365_v24  ;;  %v490_v14 = vadd.f32 %v5142_v37, %v5133_v32 }
 0x1b1   :  { %v4666_v18 = vpop.eup %4665  ;;  %4685 = vtanh.f32 %v478_v61  ;;  %v633_v11 = vadd.f32 %v4664_v7, %v4656_v57  ;;  %v544_v21 = vadd.f32 %v543_v9, %v5129_v31  ;;  %v545_v29 = vpop.f32.mrb[49].mxu0  ;;  %3615 = vmatprep.mubr.msk.bf16.mxu1 %vm865_vm4, %v5236_v6 }
 0x1b2   :  { %v4668_v36 = vpop.eup %4667  ;;  %4687 = vtanh.f32 %v480_v0  ;;  %v5249_v19 = vpack.c.bf16 %v632_v8, %v630_v1  ;;  %v546_v38 = vadd.f32 %v545_v29, %v5133_v32  ;;  %v547_v12 = vpop.f32.mrb[50].mxu0  ;;  %930 = vmatmul.mubr.bf16.gmra.mrb[4].mxu1 %v5241_v28  ;;  %v4372_v8 = vld [vmem:[%s6181_s3 + $0x50] ss:$8 sps:$4 sm:$0xff]  }
 0x1b3   :  { %v4670_v39 = vpop.eup %4669  ;;  %v5255_v40 = vpack.c.bf16 %v633_v11, %v631_v5  ;;  %4689 = vtanh.f32 %v544_v21  ;;  %v548_v13 = vadd.f32 %v547_v12, %v5129_v31  ;;  %1116 = vmatpush1.bf16.msra.mxu1 %v4363_v26  ;;  %v549_v42 = vpop.f32.mrb[51].mxu0 }
 0x1b4   :  { %v4672_v22 = vpop.eup %4671  ;;  %4691 = vtanh.f32 %v546_v38  ;;  %v550_v45 = vadd.f32 %v549_v42, %v5133_v32  ;;  %1117 = vmatprep.subr.bf16.mxu1 %v4368_v10  ;;  %v686_v47 = vunpack.c.l.b16 %v5249_v19  ;;  %v688_v12 = vunpack.c.h.b16 %v5249_v19 }
 0x1b5   :  { %v4674_v48 = vpop.eup %4673  ;;  %4693 = vtanh.f32 %v548_v13  ;;  %v687_v52 = vunpack.c.l.b16 %v5255_v40  ;;  %v4375_v13 = vld [vmem:[%s6181_s3 + $0x60] ss:$8 sps:$4 sm:$0xff]  }
 0x1b6   :  { %v4676_v34 = vpop.eup %4675  ;;  %v634_v53 = vadd.f32 %v4674_v48, %v4666_v18  ;;  %4695 = vtanh.f32 %v550_v45  ;;  %v5280_v37 = vpack.c.b16 %v686_v47, %v684_v55  ;;  %v4377_v18 = vld [vmem:[%s6181_s3 + $0x64] ss:$8 sps:$4 sm:$0xff]  }
 0x1b7   :  { %v4678_v56 = vpop.eup %4677  ;;  %4697 = vtanh.f32 %v484_v20  ;;  %v635_v15 = vadd.f32 %v4676_v34, %v4668_v36  ;;  %1118 = vmatpush1.bf16.msra.mxu1 %v4366_v43  ;;  %v5275_v57 = vpack.c.b16 %v687_v52, %v685_v51  ;;  %v4378_v52 = vld [vmem:[%s6181_s3 + $0x70] ss:$8 sps:$4 sm:$0xff]  }
 0x1b8   :  { %v4680_v58 = vpop.eup %4679  ;;  %4699 = vtanh.f32 %v486_v44  ;;  %v636_v59 = vadd.f32 %v4678_v56, %v4670_v39  ;;  %v553_v24 = vpop.f32.mrb[52].mxu0  ;;  %1119 = vmatprep.subr.bf16.mxu1 %v4371_v33  ;;  %v4380_v44 = vld [vmem:[%s6181_s3 + $0x74] ss:$8 sps:$4 sm:$0xff]  }
 0x1b9   :  { %v4682_v16 = vpop.eup %4681  ;;  %4701 = vtanh.f32 %v488_v49  ;;  %v637_v61 = vadd.f32 %v4680_v58, %v4672_v22  ;;  %v554_v62 = vadd.f32 %v553_v24, %v5129_v31  ;;  %v555_v17 = vpop.f32.mrb[53].mxu0  ;;  %3616 = vmatprep.mubr.msk.bf16.mxu1 %vm865_vm4, %v5275_v57 }
 0x1ba   :  { %v4684_v25 = vpop.eup %4683  ;;  %4703 = vtanh.f32 %v490_v14  ;;  %v5288_v0 = vpack.c.bf16 %v636_v59, %v634_v53  ;;  %v556_v1 = vadd.f32 %v555_v17, %v5133_v32  ;;  %v557_v2 = vpop.f32.mrb[54].mxu0  ;;  %940 = vmatmul.mubr.bf16.gmra.mrb[8].mxu1 %v5280_v37  ;;  %v4383_v14 = vld [vmem:[%s6181_s3 + $0x84] ss:$8 sps:$4 sm:$0xff]  }
 0x1bb   :  { %v4686_v3 = vpop.eup %4685  ;;  %v5292_v5 = vpack.c.bf16 %v637_v61, %v635_v15  ;;  %4705 = vtanh.f32 %v554_v62  ;;  %v558_v26 = vadd.f32 %v557_v2, %v5129_v31  ;;  %1120 = vmatpush1.bf16.msra.mxu1 %v4369_v35  ;;  %v559_v7 = vpop.f32.mrb[55].mxu0  ;;  %v689_v31 = vunpack.c.h.b16 %v5255_v40  ;;  %v4381_v61 = vld [vmem:[%s6181_s3 + $0x80] ss:$8 sps:$4 sm:$0xff]  }
 0x1bc   :  { %v4688_v9 = vpop.eup %4687  ;;  %4707 = vtanh.f32 %v556_v1  ;;  %v560_v10 = vadd.f32 %v559_v7, %v5133_v32  ;;  %1121 = vmatprep.subr.bf16.mxu1 %v4374_v60  ;;  %v690_v11 = vunpack.c.l.b16 %v5288_v0  ;;  %v692_v58 = vunpack.c.h.b16 %v5288_v0  ;;  %v4384_v7 = vld [vmem:[%s6181_s3 + $0x90] ss:$8 sps:$4 sm:$0xff]  }
 0x1bd   :  { %v4690_v21 = vpop.eup %4689  ;;  %4709 = vtanh.f32 %v558_v26  ;;  %v691_v29 = vunpack.c.l.b16 %v5292_v5  ;;  %v693_v56 = vunpack.c.h.b16 %v5292_v5 }
 0x1be   :  { %v4692_v36 = vpop.eup %4691  ;;  %v638_v38 = vadd.f32 %v4690_v21, %v4682_v16  ;;  %4711 = vtanh.f32 %v560_v10  ;;  %v5311_v22 = vpack.c.b16 %v690_v11, %v688_v12  ;;  %v4391_v11 = vld [vmem:[%s6181_s3 + $0x154] ss:$8 sps:$4 sm:$0xff]   ;;  %v4394_v21 = vld [vmem:[%s6181_s3 + $0x164] ss:$8 sps:$4 sm:$0xff]  }
 0x1bf   :  { %v4694_v39 = vpop.eup %4693  ;;  %v639_v32 = vadd.f32 %v4692_v36, %v4684_v25  ;;  %1122 = vmatpush1.bf16.msra.mxu1 %v4372_v8  ;;  %v5306_v20 = vpack.c.b16 %v691_v29, %v689_v31  ;;  %v4386_v25 = vld [vmem:[%s6181_s3 + $0x94] ss:$8 sps:$4 sm:$0xff]   ;;  %v4392_v31 = vld [vmem:[%s6181_s3 + $0x160] ss:$8 sps:$4 sm:$0xff]   ;;  %v4395_v36 = vld [vmem:[%s6181_s3 + $0x170] ss:$8 sps:$4 sm:$0xff]  }
 0x1c0   :  { %v4696_v42 = vpop.eup %4695  ;;  %v640_v43 = vadd.f32 %v4694_v39, %v4686_v3  ;;  %1123 = vmatprep.subr.bf16.mxu1 %v4377_v18  ;;  %v722_v3 = vld [vmem:[%s6181_s3 + $0xa0] sm:$0xff]  ;;  %v4397_v29 = vld [vmem:[%s6181_s3 + $0x174] ss:$8 sps:$4 sm:$0xff]   ;;  %v4401_v39 = vld [vmem:[%s6181_s3 + $0x190] ss:$8 sps:$4 sm:$0xff]  }
 0x1c1   :  { %v4698_v45 = vpop.eup %4697  ;;  %v641_v33 = vadd.f32 %v4696_v42, %v4688_v9  ;;  %3617 = vmatprep.mubr.msk.bf16.mxu1 %vm865_vm4, %v5306_v20  ;;  %v3640_v9 = vcombine.high %v722_v3, %v722_v3  ;;  %v3639_v10 = vcombine.low %v722_v3, %v722_v3  ;;  %v4403_v12 = vld [vmem:[%s6181_s3 + $0x194] ss:$8 sps:$4 sm:$0xff]  }
 0x1c2   :  { %v4700_v47 = vpop.eup %4699  ;;  %950 = vmatmul.mubr.bf16.gmra.mrb[12].mxu1 %v5311_v22  ;;  %v5319_v48 = vpack.c.bf16 %v640_v43, %v638_v38  ;;  %v4398_v38 = vld [vmem:[%s6181_s3 + $0x180] ss:$8 sps:$4 sm:$0xff]   ;;  %v4409_v42 = vld [vmem:[%s6181_s3 + $0x1b4] ss:$8 sps:$4 sm:$0xff]   ;;  %v4407_v43 = vld [vmem:[%s6181_s3 + $0x1b0] ss:$8 sps:$4 sm:$0xff]  }
 0x1c3   :  { %v4702_v49 = vpop.eup %4701  ;;  %v5321_v51 = vpack.c.bf16 %v641_v33, %v639_v32  ;;  %1124 = vmatpush1.bf16.msra.mxu1 %v4375_v13  ;;  %v1106_v18 = vsel %vm99_vm1, %v3639_v10, 0  ;;  %v4406_v32 = vld [vmem:[%s6181_s3 + $0x1a4] ss:$8 sps:$4 sm:$0xff]   ;;  %v4404_v13 = vld [vmem:[%s6181_s3 + $0x1a0] ss:$8 sps:$4 sm:$0xff]  }
 0x1c4   :  { %v4704_v34 = vpop.eup %4703  ;;  %1125 = vmatprep.subr.bf16.mxu1 %v4380_v44  ;;  %v694_v53 = vunpack.c.l.b16 %v5319_v48  ;;  %v4412_v44 = vld [vmem:[%s6181_s3 + $0x1c4] ss:$8 sps:$4 sm:$0xff]   ;;  %v4415_v33 = vld [vmem:[%s6181_s3 + $0x1d4] ss:$8 sps:$4 sm:$0xff]  }
 0x1c5   :  { %v4706_v55 = vpop.eup %4705  ;;  %v695_v15 = vunpack.c.l.b16 %v5321_v51  ;;  %v4435_v10 = vld [vmem:[%s6181_s3 + $0x23c] ss:$8 sps:$4 sm:$0xff]  }
 0x1c6   :  { %v4708_v35 = vpop.eup %4707  ;;  %v642_v59 = vadd.f32 %v4706_v55, %v4698_v45  ;;  %v5338_v17 = vpack.c.b16 %v694_v53, %v692_v58  ;;  %v4410_v45 = vld [vmem:[%s6181_s3 + $0x1c0] ss:$8 sps:$4 sm:$0xff]  }
 0x1c7   :  { %v4710_v24 = vpop.eup %4709  ;;  %v643_v60 = vadd.f32 %v4708_v35, %v4700_v47  ;;  %1126 = vmatpush1.bf16.msra.mxu1 %v4378_v52  ;;  %v5333_v16 = vpack.c.b16 %v695_v15, %v693_v56  ;;  %v4413_v47 = vld [vmem:[%s6181_s3 + $0x1d0] ss:$8 sps:$4 sm:$0xff]   ;;  %v4760_v56 = vmov 0  }
 0x1c8   :  { %v4712_v62 = vpop.eup %4711  ;;  %1127 = vmatprep.subr.bf16.mxu1 %v4383_v14  ;;  %v644_v1 = vadd.f32 %v4710_v24, %v4702_v49  ;;  %v4418_v49 = vld [vmem:[%s6181_s3 + $0x1e4] ss:$8 sps:$4 sm:$0xff]   ;;  %v3667_v52 = vld [vmem:[%s6181_s3 + $0x1f0] sm:$0xff]  ;;  %2119 = vmatprep.subr.bf16.mxu0 %v4760_v56  ;;  %v4486_v35 = vld [vmem:[%s6183_s5 + $0x58] sm:$0xff]  }
 0x1c9   :  { %v645_v2 = vadd.f32 %v4712_v62, %v4704_v34  ;;  %3618 = vmatprep.mubr.msk.bf16.mxu1 %vm865_vm4, %v5333_v16  ;;  %v4416_v34 = vld [vmem:[%s6181_s3 + $0x1e0] ss:$8 sps:$4 sm:$0xff]   ;;  %v3688_v14 = vcombine.low %v3667_v52, %v3667_v52  ;;  %v3689_v53 = vcombine.high %v3667_v52, %v3667_v52  ;;  %v4485_v15 = vld [vmem:[%s6183_s5 + $0x50] sm:$0xff]  }
 0x1ca   :  { %960 = vmatmul.mubr.bf16.gmra.mrb[16].mxu1 %v5338_v17  ;;  %v5349_v26 = vpack.c.bf16 %v644_v1, %v642_v59  ;;  %2120 = vmatpush1.bf16.msra.mxu0 %v4485_v15  ;;  %v4421_v58 = vld [vmem:[%s6181_s3 + $0x1f8] ss:$8 sps:$4 sm:$0xff]   ;;  %v4426_v24 = vld [vmem:[%s6181_s3 + $0x20c] ss:$8 sps:$4 sm:$0xff]   ;;  %v4424_v62 = vld [vmem:[%s6181_s3 + $0x208] ss:$8 sps:$4 sm:$0xff]  }
 0x1cb   :  { %1128 = vmatpush1.bf16.msra.mxu1 %v4381_v61  ;;  %3642 = vmatprep.mubr.msk.bf16.mxu1 %vm865_vm4, %v5174_v46  ;;  %v5356_v8 = vpack.c.bf16 %v645_v2, %v643_v60  ;;  %v4389_v46 = vld [vmem:[%s6181_s3 + $0x150] ss:$8 sps:$4 sm:$0xff]   ;;  %v1328_v55 = vsel %vm99_vm1, %v3688_v14, 0  ;;  %v4487_v60 = vld [vmem:[%s6183_s5 + $0x60] sm:$0xff]   ;;  %v4488_v1 = vld [vmem:[%s6183_s5 + $0x68] sm:$0xff]  }
 0x1cc   :  { %1129 = vmatprep.subr.bf16.mxu1 %v4386_v25  ;;  %2121 = vmatprep.subr.bf16.mxu0 %v4760_v56  ;;  %v5457_v59 = vld [vmem:[%s6181_s3 + $0x298] sm:$0xff]  ;;  %v4432_v2 = vld [vmem:[%s6181_s3 + $0x22c] ss:$8 sps:$4 sm:$0xff]   ;;  %v4459_v52 = vld [vmem:[%s6181_s3 + $0x2c0] ss:$8 sps:$4 sm:$0xff]  }
 0x1cd   :  { %v3737_v61 = vcombine.low %v5457_v59, %v5457_v59  ;;  %v4429_v25 = vld [vmem:[%s6181_s3 + $0x21c] ss:$8 sps:$4 sm:$0xff]   ;;  %v4465_v14 = vld [vmem:[%s6181_s3 + $0x2e0] ss:$8 sps:$4 sm:$0xff]  }
 0x1ce   :  { %2122 = vmatpush1.bf16.msra.mxu0 %v4486_v35  ;;  %v4471_v15 = vld [vmem:[%s6181_s3 + $0x300] ss:$8 sps:$4 sm:$0xff]  }
 0x1cf   :  { %1130 = vmatpush1.bf16.msra.mxu1 %v4384_v7  ;;  %2123 = vmatprep.subr.bf16.mxu0 %v4760_v56  ;;  %v1570_v3 = vsel %vm99_vm1, %v3737_v61, 0  ;;  %v4489_v7 = vld [vmem:[%s6183_s5 + $0x70] sm:$0xff]  }
 0x1d0   :  { %3641 = vmatprep.subr.msk.bf16.mxu1 %vm99_vm1, %v3640_v9  ;;  %v4430_v9 = vld [vmem:[%s6181_s3 + $0x228] ss:$8 sps:$4 sm:$0xff]   ;;  %v4482_v61 = vld [vmem:[%s6181_s3 + $0x334] ss:$8 sps:$4 sm:$0xff]  }
 0x1d2   :  { %2124 = vmatpush1.bf16.msra.mxu0 %v4487_v60 }
 0x1d3   :  { %1132 = vmatpush1.bf16.msra.mxu1 %v1106_v18  ;;  %2125 = vmatprep.subr.bf16.mxu0 %v4760_v56  ;;  %v4490_v18 = vld [vmem:[%s6183_s5 + $0x78] sm:$0xff]  }
 0x1d4   :  { %1333 = vmatprep.subr.bf16.mxu1 %v4391_v11  ;;  %v4433_v11 = vld [vmem:[%s6181_s3 + $0x238] ss:$8 sps:$4 sm:$0xff]  }
 0x1d6   :  { %1144 = vmatmul.mubr.bf16.vlgmr.msra.gmra.mrb[0].mxu1 %v5169_v41  ;;  %v4400_v41 = vld [vmem:[%s6181_s3 + $0x184] ss:$8 sps:$4 sm:$0xff]   ;;  %2126 = vmatpush1.bf16.msra.mxu0 %v4488_v1 }
 0x1d7   :  { %3643 = vmatprep.mubr.msk.bf16.mxu1 %vm865_vm4, %v5190_v4  ;;  %1334 = vmatpush1.bf16.msra.mxu1 %v4389_v46  ;;  %v4438_v46 = vld [vmem:[%s6181_s3 + $0x24c] ss:$8 sps:$4 sm:$0xff]  }
 0x1d8   :  { %1335 = vmatprep.subr.bf16.mxu1 %v4394_v21  ;;  %2127 = vmatprep.subr.bf16.mxu0 %v4760_v56  ;;  %v4491_v21 = vld [vmem:[%s6183_s5 + $0x80] sm:$0xff]  }
 0x1da   :  { %2128 = vmatpush1.bf16.msra.mxu0 %v4489_v7  ;;  %v4495_v7 = vld [vmem:[%s6183_s5 + $0x100] sm:$0xff]  }
 0x1db   :  { %1336 = vmatpush1.bf16.msra.mxu1 %v4392_v31  ;;  %2129 = vmatprep.subr.bf16.mxu0 %v4760_v56  ;;  %v4436_v31 = vld [vmem:[%s6181_s3 + $0x248] ss:$8 sps:$4 sm:$0xff]  }
 0x1dc   :  { %1337 = vmatprep.subr.bf16.mxu1 %v4397_v29  ;;  %v4441_v29 = vld [vmem:[%s6181_s3 + $0x25c] ss:$8 sps:$4 sm:$0xff]  }
 0x1de   :  { %1154 = vmatmul.mubr.bf16.gmra.mrb[4].mxu1 %v5185_v63  ;;  %2130 = vmatpush1.bf16.msra.mxu0 %v4490_v18 }
 0x1df   :  { %3644 = vmatprep.mubr.msk.bf16.mxu1 %vm865_vm4, %v5216_v54  ;;  %1338 = vmatpush1.bf16.msra.mxu1 %v4395_v36  ;;  %v4492_v36 = vld [vmem:[%s6183_s5 + $0x88] sm:$0xff]  }
 0x1e0   :  { %1339 = vmatprep.subr.bf16.mxu1 %v4400_v41  ;;  %2131 = vmatprep.subr.bf16.mxu0 %v4760_v56  ;;  %v4439_v41 = vld [vmem:[%s6181_s3 + $0x258] ss:$8 sps:$4 sm:$0xff]  }
 0x1e2   :  { %2132 = vmatpush1.bf16.msra.mxu0 %v4491_v21 }
 0x1e3   :  { %1340 = vmatpush1.bf16.msra.mxu1 %v4398_v38  ;;  %v4444_v38 = vld [vmem:[%s6181_s3 + $0x26c] ss:$8 sps:$4 sm:$0xff]   ;;  %2133 = vmatprep.subr.bf16.mxu0 %v4760_v56 }
 0x1e4   :  { %1341 = vmatprep.subr.bf16.mxu1 %v4403_v12  ;;  %v4496_v12 = vld [vmem:[%s6183_s5 + $0x90] sm:$0xff]  }
 0x1e6   :  { %1164 = vmatmul.mubr.bf16.gmra.mrb[8].mxu1 %v5211_v50  ;;  %2134 = vmatpush1.bf16.msra.mxu0 %v4492_v36 }
 0x1e7   :  { %3645 = vmatprep.mubr.msk.bf16.mxu1 %vm865_vm4, %v5255_v40  ;;  %1342 = vmatpush1.bf16.msra.mxu1 %v4401_v39  ;;  %v4442_v39 = vld [vmem:[%s6181_s3 + $0x268] ss:$8 sps:$4 sm:$0xff]  }
 0x1e8   :  { %1343 = vmatprep.subr.bf16.mxu1 %v4406_v32  ;;  %v4447_v32 = vld [vmem:[%s6181_s3 + $0x27c] ss:$8 sps:$4 sm:$0xff]   ;;  %2135 = vmatprep.subr.bf16.mxu0 %v4760_v56 }
 0x1ea   :  { %2136 = vmatpush1.bf16.msra.mxu0 %v4496_v12 }
 0x1eb   :  { %1344 = vmatpush1.bf16.msra.mxu1 %v4404_v13  ;;  %v4445_v13 = vld [vmem:[%s6181_s3 + $0x278] ss:$8 sps:$4 sm:$0xff]   ;;  %2137 = vmatprep.subr.bf16.mxu0 %v4760_v56 }
 0x1ec   :  { %1345 = vmatprep.subr.bf16.mxu1 %v4409_v42  ;;  %v4450_v42 = vld [vmem:[%s6181_s3 + $0x28c] ss:$8 sps:$4 sm:$0xff]  }
 0x1ee   :  { %1174 = vmatmul.mubr.bf16.gmra.mrb[12].mxu1 %v5249_v19 }
 0x1ef   :  { %3646 = vmatprep.mubr.msk.bf16.mxu1 %vm865_vm4, %v5292_v5  ;;  %1346 = vmatpush1.bf16.msra.mxu1 %v4407_v43  ;;  %v4448_v43 = vld [vmem:[%s6181_s3 + $0x288] ss:$8 sps:$4 sm:$0xff]  }
 0x1f0   :  { %1347 = vmatprep.subr.bf16.mxu1 %v4412_v44  ;;  %v3738_v44 = vcombine.high %v5457_v59, %v5457_v59  ;;  %v4479_v59 = vld [vmem:[%s6181_s3 + $0x324] ss:$8 sps:$4 sm:$0xff]  }
 0x1f3   :  { %1348 = vmatpush1.bf16.msra.mxu1 %v4410_v45  ;;  %v4455_v45 = vld [vmem:[%s6181_s3 + $0x2a4] ss:$8 sps:$4 sm:$0xff]  }
 0x1f4   :  { %1349 = vmatprep.subr.bf16.mxu1 %v4415_v33  ;;  %v4453_v33 = vld [vmem:[%s6181_s3 + $0x2a0] ss:$8 sps:$4 sm:$0xff]  }
 0x1f6   :  { %1184 = vmatmul.mubr.bf16.gmra.mrb[16].mxu1 %v5288_v0 }
 0x1f7   :  { %1350 = vmatpush1.bf16.msra.mxu1 %v4413_v47  ;;  %3691 = vmatprep.mubr.msk.bf16.mxu1 %vm865_vm4, %v5190_v4  ;;  %v4423_v4 = vld [vmem:[%s6181_s3 + $0x1fc] ss:$8 sps:$4 sm:$0xff]  }
 0x1f8   :  { %1351 = vmatprep.subr.bf16.mxu1 %v4418_v49  ;;  %v4458_v47 = vld [vmem:[%s6181_s3 + $0x2b4] ss:$8 sps:$4 sm:$0xff]   ;;  %v4461_v49 = vld [vmem:[%s6181_s3 + $0x2c4] ss:$8 sps:$4 sm:$0xff]  }
 0x1fb   :  { %1352 = vmatpush1.bf16.msra.mxu1 %v4416_v34  ;;  %v4464_v34 = vld [vmem:[%s6181_s3 + $0x2d4] ss:$8 sps:$4 sm:$0xff]  }
 0x1fc   :  { %3690 = vmatprep.subr.msk.bf16.mxu1 %vm99_vm1, %v3689_v53  ;;  %v4470_v53 = vld [vmem:[%s6181_s3 + $0x2f4] ss:$8 sps:$4 sm:$0xff]  }
 0x1ff   :  { %1354 = vmatpush1.bf16.msra.mxu1 %v1328_v55  ;;  %v699_v55 = vunpack.c.l.b16 %v5356_v8 }
 0x200   :  { %1575 = vmatprep.subr.bf16.mxu1 %v4423_v4  ;;  %v697_v4 = vunpack.c.h.b16 %v5321_v51 }
 0x202   :  { %1366 = vmatmul.mubr.bf16.vlgmr.msra.gmra.mrb[0].mxu1 %v5185_v63  ;;  %v4427_v63 = vld [vmem:[%s6181_s3 + $0x218] ss:$8 sps:$4 sm:$0xff]   ;;  %v1459_v35 = vpack.c.b16 %v699_v55, %v697_v4 }
 0x203   :  { %3692 = vmatprep.mubr.msk.bf16.mxu1 %vm865_vm4, %v5216_v54  ;;  %1576 = vmatpush1.bf16.msra.mxu1 %v4421_v58  ;;  %v698_v58 = vunpack.c.l.b16 %v5349_v26 }
 0x204   :  { %1577 = vmatprep.subr.bf16.mxu1 %v4426_v24  ;;  %v696_v24 = vunpack.c.h.b16 %v5319_v48 }
 0x206   :  { %v1458_v60 = vpack.c.b16 %v698_v58, %v696_v24 }
 0x207   :  { %1578 = vmatpush1.bf16.msra.mxu1 %v4424_v62  ;;  %v3765_v62 = vld [vmem:[%s6181_s3 + $0x340] sm:$0xff] }
 0x208   :  { %1579 = vmatprep.subr.bf16.mxu1 %v4429_v25  ;;  %v4480_v25 = vld [vmem:[%s6181_s3 + $0x330] ss:$8 sps:$4 sm:$0xff]   ;;  %v3786_v1 = vcombine.low %v3765_v62, %v3765_v62 }
 0x20a   :  { %1376 = vmatmul.mubr.bf16.gmra.mrb[4].mxu1 %v5211_v50 }
 0x20b   :  { %3693 = vmatprep.mubr.msk.bf16.mxu1 %vm865_vm4, %v5255_v40  ;;  %1580 = vmatpush1.bf16.msra.mxu1 %v4427_v63  ;;  %v3787_v63 = vcombine.high %v3765_v62, %v3765_v62 }
 0x20c   :  { %1581 = vmatprep.subr.bf16.mxu1 %v4432_v2  ;;  %v1812_v2 = vsel %vm99_vm1, %v3786_v1, 0 }
 0x20f   :  { %1582 = vmatpush1.bf16.msra.mxu1 %v4430_v9 }
 0x210   :  { %1583 = vmatprep.subr.bf16.mxu1 %v4435_v10 }
 0x212   :  { %1386 = vmatmul.mubr.bf16.gmra.mrb[8].mxu1 %v5249_v19 }
 0x213   :  { %3694 = vmatprep.mubr.msk.bf16.mxu1 %vm865_vm4, %v5292_v5  ;;  %1584 = vmatpush1.bf16.msra.mxu1 %v4433_v11 }
 0x214   :  { %1585 = vmatprep.subr.bf16.mxu1 %v4438_v46 }
 0x217   :  { %1586 = vmatpush1.bf16.msra.mxu1 %v4436_v31 }
 0x218   :  { %1587 = vmatprep.subr.bf16.mxu1 %v4441_v29 }
 0x21a   :  { %1396 = vmatmul.mubr.bf16.gmra.mrb[12].mxu1 %v5288_v0 }
 0x21b   :  { %3695 = vmatprep.mubr.msk.bf16.mxu1 %vm865_vm4, %v5321_v51  ;;  %1588 = vmatpush1.bf16.msra.mxu1 %v4439_v41 }
 0x21c   :  { %1589 = vmatprep.subr.bf16.mxu1 %v4444_v38 }
 0x21f   :  { %1590 = vmatpush1.bf16.msra.mxu1 %v4442_v39 }
 0x220   :  { %1591 = vmatprep.subr.bf16.mxu1 %v4447_v32 }
 0x222   :  { %1406 = vmatmul.mubr.bf16.gmra.mrb[16].mxu1 %v5319_v48 }
 0x223   :  { %1592 = vmatpush1.bf16.msra.mxu1 %v4445_v13  ;;  %3740 = vmatprep.mubr.msk.bf16.mxu1 %vm865_vm4, %v5236_v6  ;;  %v4456_v6 = vld [vmem:[%s6181_s3 + $0x2b0] ss:$8 sps:$4 sm:$0xff]  }
 0x224   :  { %1593 = vmatprep.subr.bf16.mxu1 %v4450_v42 }
 0x227   :  { %1594 = vmatpush1.bf16.msra.mxu1 %v4448_v43 }
 0x228   :  { %3739 = vmatprep.subr.msk.bf16.mxu1 %vm99_vm1, %v3738_v44 }
 0x22b   :  { %1596 = vmatpush1.bf16.msra.mxu1 %v1570_v3  ;;  %v4493_v3 = vld [vmem:[%s6183_s5 + $0xf0] sm:$0xff]  }
 0x22c   :  { %1817 = vmatprep.subr.bf16.mxu1 %v4455_v45 }
 0x22e   :  { %1608 = vmatmul.mubr.bf16.vlgmr.msra.gmra.mrb[0].mxu1 %v5241_v28  ;;  %v4462_v28 = vld [vmem:[%s6181_s3 + $0x2d0] ss:$8 sps:$4 sm:$0xff]  }
 0x22f   :  { %3741 = vmatprep.mubr.msk.bf16.mxu1 %vm865_vm4, %v5275_v57  ;;  %1818 = vmatpush1.bf16.msra.mxu1 %v4453_v33  ;;  %v4467_v57 = vld [vmem:[%s6181_s3 + $0x2e4] ss:$8 sps:$4 sm:$0xff]  }
 0x230   :  { %1819 = vmatprep.subr.bf16.mxu1 %v4458_v47  ;;  %v4503_v47 = vld [vmem:[%s6183_s5] sm:$0xff]  }
 0x233   :  { %1820 = vmatpush1.bf16.msra.mxu1 %v4456_v6 }
 0x234   :  { %1821 = vmatprep.subr.bf16.mxu1 %v4461_v49 }
 0x236   :  { %1618 = vmatmul.mubr.bf16.gmra.mrb[4].mxu1 %v5280_v37  ;;  %v4468_v37 = vld [vmem:[%s6181_s3 + $0x2f0] ss:$8 sps:$4 sm:$0xff]  }
 0x237   :  { %3742 = vmatprep.mubr.msk.bf16.mxu1 %vm865_vm4, %v5306_v20  ;;  %1822 = vmatpush1.bf16.msra.mxu1 %v4459_v52  ;;  %v4473_v20 = vld [vmem:[%s6181_s3 + $0x304] ss:$8 sps:$4 sm:$0xff]  }
 0x238   :  { %1823 = vmatprep.subr.bf16.mxu1 %v4464_v34 }
 0x23b   :  { %1824 = vmatpush1.bf16.msra.mxu1 %v4462_v28 }
 0x23c   :  { %1825 = vmatprep.subr.bf16.mxu1 %v4467_v57 }
 0x23e   :  { %1628 = vmatmul.mubr.bf16.gmra.mrb[8].mxu1 %v5311_v22  ;;  %v4476_v22 = vld [vmem:[%s6181_s3 + $0x314] ss:$8 sps:$4 sm:$0xff]  }
 0x23f   :  { %3743 = vmatprep.mubr.msk.bf16.mxu1 %vm865_vm4, %v5333_v16  ;;  %1826 = vmatpush1.bf16.msra.mxu1 %v4465_v14  ;;  %v4474_v16 = vld [vmem:[%s6181_s3 + $0x310] ss:$8 sps:$4 sm:$0xff]   ;;  %v4505_v14 = vld [vmem:[%s6183_s5 + $0x8] sm:$0xff]  }
 0x240   :  { %1827 = vmatprep.subr.bf16.mxu1 %v4470_v53 }
 0x243   :  { %1828 = vmatpush1.bf16.msra.mxu1 %v4468_v37 }
 0x244   :  { %1829 = vmatprep.subr.bf16.mxu1 %v4473_v20 }
 0x246   :  { %1638 = vmatmul.mubr.bf16.gmra.mrb[12].mxu1 %v5338_v17  ;;  %v4477_v17 = vld [vmem:[%s6181_s3 + $0x320] ss:$8 sps:$4 sm:$0xff]  }
 0x247   :  { %3744 = vmatprep.mubr.msk.bf16.mxu1 %vm865_vm4, %v1459_v35  ;;  %1830 = vmatpush1.bf16.msra.mxu1 %v4471_v15  ;;  %v4508_v35 = vld [vmem:[%s6183_s5 + $0x190] sm:$0xff]  }
 0x248   :  { %1831 = vmatprep.subr.bf16.mxu1 %v4476_v22  ;;  %v4507_v22 = vld [vmem:[%s6183_s5 + $0x10] sm:$0xff]  }
 0x24b   :  { %1832 = vmatpush1.bf16.msra.mxu1 %v4474_v16 }
 0x24c   :  { %1833 = vmatprep.subr.bf16.mxu1 %v4479_v59 }
 0x24e   :  { %1648 = vmatmul.mubr.bf16.gmra.mrb[16].mxu1 %v1458_v60  ;;  %v4509_v60 = vld [vmem:[%s6183_s5 + $0x18] sm:$0xff]  }
 0x24f   :  { %1834 = vmatpush1.bf16.msra.mxu1 %v4477_v17  ;;  %3789 = vmatprep.mubr.msk.bf16.mxu1 %vm865_vm4, %v5216_v54  ;;  %v4494_v54 = vld [vmem:[%s6183_s5 + $0xf8] sm:$0xff]  }
 0x250   :  { %1835 = vmatprep.subr.bf16.mxu1 %v4482_v61  ;;  %v4510_v61 = vld [vmem:[%s6183_s5 + $0x198] sm:$0xff]  }
 0x253   :  { %1836 = vmatpush1.bf16.msra.mxu1 %v4480_v25 }
 0x254   :  { %3788 = vmatprep.subr.msk.bf16.mxu1 %vm99_vm1, %v3787_v63 }
 0x257   :  { %1838 = vmatpush1.bf16.msra.mxu1 %v1812_v2 }
 0x258   :  { %2480 = vmatprep.subr.bf16.mxu1 %v4760_v56 }
 0x25a   :  { %1850 = vmatmul.mubr.bf16.vlgmr.msra.gmra.mrb[0].mxu1 %v5211_v50  ;;  %v4497_v50 = vld [vmem:[%s6183_s5 + $0x108] sm:$0xff]  }
 0x25b   :  { %3790 = vmatprep.mubr.msk.bf16.mxu1 %vm865_vm4, %v5255_v40  ;;  %2481 = vmatpush1.bf16.msra.mxu1 %v4493_v3  ;;  %v4499_v40 = vld [vmem:[%s6183_s5 + $0x118] sm:$0xff]   ;;  %v4511_v3 = vld [vmem:[%s6183_s5 + $0x20] sm:$0xff]  }
 0x25c   :  { %2482 = vmatprep.subr.bf16.mxu1 %v4760_v56 }
 0x25f   :  { %2483 = vmatpush1.bf16.msra.mxu1 %v4494_v54  ;;  %v4512_v54 = vld [vmem:[%s6183_s5 + $0x1a0] sm:$0xff]  }
 0x260   :  { %2484 = vmatprep.subr.bf16.mxu1 %v4760_v56 }
 0x262   :  { %1860 = vmatmul.mubr.bf16.gmra.mrb[4].mxu1 %v5249_v19  ;;  %v4498_v19 = vld [vmem:[%s6183_s5 + $0x110] sm:$0xff]  }
 0x263   :  { %3791 = vmatprep.mubr.msk.bf16.mxu1 %vm865_vm4, %v5292_v5  ;;  %2485 = vmatpush1.bf16.msra.mxu1 %v4495_v7  ;;  %v4500_v5 = vld [vmem:[%s6183_s5 + $0x98] sm:$0xff]  }
 0x264   :  { %2486 = vmatprep.subr.bf16.mxu1 %v4760_v56  ;;  %2138 = vmatpush1.bf16.msra.mxu0 %v4500_v5  ;;  %v4513_v5 = vld [vmem:[%s6183_s5 + $0x28] sm:$0xff]  }
 0x265   :  { %2225 = vmatprep.subr.bf16.mxu0 %v4760_v56 }
 0x267   :  { %2487 = vmatpush1.bf16.msra.mxu1 %v4497_v50 }
 0x268   :  { %2488 = vmatprep.subr.bf16.mxu1 %v4760_v56 }
 0x26a   :  { %1870 = vmatmul.mubr.bf16.gmra.mrb[8].mxu1 %v5288_v0  ;;  %v4501_v0 = vld [vmem:[%s6183_s5 + $0x120] sm:$0xff]  }
 0x26b   :  { %3792 = vmatprep.mubr.msk.bf16.mxu1 %vm865_vm4, %v5321_v51  ;;  %2489 = vmatpush1.bf16.msra.mxu1 %v4498_v19  ;;  %v4504_v51 = vld [vmem:[%s6183_s5 + $0x130] sm:$0xff]  }
 0x26c   :  { %2490 = vmatprep.subr.bf16.mxu1 %v4760_v56 }
 0x26f   :  { %2491 = vmatpush1.bf16.msra.mxu1 %v4499_v40 }
 0x270   :  { %2492 = vmatprep.subr.bf16.mxu1 %v4760_v56 }
 0x272   :  { %1880 = vmatmul.mubr.bf16.gmra.mrb[12].mxu1 %v5319_v48  ;;  %v4502_v48 = vld [vmem:[%s6183_s5 + $0x128] sm:$0xff]  }
 0x273   :  { %3793 = vmatprep.mubr.msk.bf16.mxu1 %vm865_vm4, %v5356_v8  ;;  %2493 = vmatpush1.bf16.msra.mxu1 %v4501_v0  ;;  %v1920_v8 = vld [vmem:[%s6184_s4] sm:$0x3] }
 0x274   :  { %2494 = vmatprep.subr.bf16.mxu1 %v4760_v56  ;;  %v5708_v9 = vrot.slane %v1920_v8, %v256_v30  ;;  %v5714_v18 = vrot.slane %v1920_v8, %v252_v27  ;;  %v4516_v8 = vld [vmem:[%s6183_s5 + $0x1b0] sm:$0xff]  }
 0x277   :  { %2495 = vmatpush1.bf16.msra.mxu1 %v4502_v48  ;;  %v4514_v48 = vld [vmem:[%s6183_s5 + $0x1a8] sm:$0xff]  }
 0x278   :  { %2496 = vmatprep.subr.bf16.mxu1 %v4760_v56 }
 0x27a   :  { %1890 = vmatmul.mubr.bf16.gmra.mrb[16].mxu1 %v5349_v26  ;;  %v4506_v26 = vld [vmem:[%s6183_s5 + $0x138] sm:$0xff]  }
 0x27b   :  { %2497 = vmatpush1.bf16.msra.mxu1 %v4504_v51 }
 0x27c   :  { %2498 = vmatprep.subr.bf16.mxu1 %v4760_v56 }
 0x27f   :  { %2499 = vmatpush1.bf16.msra.mxu1 %v4506_v26  ;;  %v4515_v26 = vld [vmem:[%s6183_s5 + $0x30] sm:$0xff]  }
 0x280   :  { %2736 = vmatprep.subr.bf16.mxu1 %v4760_v56 }
 0x32d   :  { %v5710_v10 = vpop.f32.mrb[0].mxu1 }
 0x32e   :  { %v1853_v11 = vpop.f32.mrb[1].mxu1  ;;  %v1932_v51 = vadd.f32 %v5714_v18, %v5710_v10  ;;  %v4517_v10 = vld [vmem:[%s6183_s5 + $0x38] sm:$0xff]  }
 0x32f   :  { %v1933_v46 = vadd.f32 %v5708_v9, %v1853_v11  ;;  %v1855_v21 = vpop.f32.mrb[2].mxu1 }
 0x330   :  { %v1934_v31 = vadd.f32 %v5714_v18, %v1855_v21  ;;  %v1857_v29 = vpop.f32.mrb[3].mxu1  ;;  %v4519_v21 = vld [vmem:[%s6183_s5 + $0x40] sm:$0xff]  }
 0x331   :  { %4713 = vtanh.f32 %v1933_v46  ;;  %v1935_v36 = vadd.f32 %v5708_v9, %v1857_v29  ;;  %v4518_v46 = vld [vmem:[%s6183_s5 + $0x1b8] sm:$0xff]  }
 0x332   :  { %4715 = vtanh.f32 %v1934_v31  ;;  %v4520_v31 = vld [vmem:[%s6183_s5 + $0x1c0] sm:$0xff]  }
 0x333   :  { %4717 = vtanh.f32 %v1935_v36 }
 0x335   :  { %v1861_v30 = vpop.f32.mrb[4].mxu1 }
 0x336   :  { %v5720_v41 = vadd.f32 %v5714_v18, %v1861_v30  ;;  %v5722_v38 = vpop.f32.mrb[5].mxu1  ;;  %v4521_v30 = vld [vmem:[%s6183_s5 + $0x48] sm:$0xff]  }
 0x337   :  { %v1865_v23 = vpop.f32.mrb[6].mxu1  ;;  %v1937_v11 = vadd.f32 %v5708_v9, %v5722_v38  ;;  %v4522_v38 = vld [vmem:[%s6183_s5 + $0x1c8] sm:$0xff]  }
 0x338   :  { %v1938_v27 = vadd.f32 %v5714_v18, %v1865_v23  ;;  %v1867_v12 = vpop.f32.mrb[7].mxu1 }
 0x339   :  { %v1939_v39 = vadd.f32 %v5708_v9, %v1867_v12  ;;  %v4524_v12 = vld [vmem:[%s6183_s5 + $0x1d0] sm:$0xff]  }
 0x33a   :  { %4719 = vtanh.f32 %v1938_v27 }
 0x33b   :  { %v4714_v32 = vpop.eup %4713  ;;  %4721 = vtanh.f32 %v1939_v39 }
 0x33c   :  { %v4716_v13 = vpop.eup %4715  ;;  %v4126_v34 = vpack.c.bf16 %v4714_v32, %v4714_v32  ;;  %v4525_v32 = vld [vmem:[%s6183_s5 + $0xa8] sm:$0xff]  }
 0x33d   :  { %v4718_v42 = vpop.eup %4717  ;;  %v1871_v43 = vpop.f32.mrb[8].mxu1  ;;  %v4123_v6 = vpack.c.bf16 %v4716_v13, %v4716_v13  ;;  %v4526_v13 = vld [vmem:[%s6183_s5 + $0x1d8] sm:$0xff]  }
 0x33e   :  { %v4124_v44 = vpack.c.bf16 %v4718_v42, %v4718_v42  ;;  %v5727_v45 = vadd.f32 %v5714_v18, %v1871_v43  ;;  %v1873_v33 = vpop.f32.mrb[9].mxu1 }
 0x33f   :  { %v5733_v49 = vadd.f32 %v5708_v9, %v1873_v33  ;;  %v5735_v52 = vpop.f32.mrb[10].mxu1  ;;  %v4528_v33 = vld [vmem:[%s6183_s5 + $0x230] sm:$0xff]  }
 0x340   :  { %v1877_v28 = vpop.f32.mrb[11].mxu1  ;;  %3826 = vmatprep.mubr.msk.bf16.mxu0 %vm97_vm2, %v4124_v44  ;;  %v1942_v29 = vadd.f32 %v5714_v18, %v5735_v52  ;;  %v4527_v44 = vld [vmem:[%s6183_s5 + $0xb0] sm:$0xff]   ;;  %v4529_v52 = vld [vmem:[%s6183_s5 + $0xb8] sm:$0xff]  }
 0x341   :  { %v1943_v57 = vadd.f32 %v5708_v9, %v1877_v28  ;;  %2152 = vmatmul.mubr.bf16.vlgmr.msra.gmra.mrb[56].mxu0 %v4123_v6  ;;  %v4531_v28 = vld [vmem:[%s6183_s5 + $0xc0] sm:$0xff]  }
 0x342   :  { %2226 = vmatpush1.bf16.msra.mxu0 %v4503_v47  ;;  %3839 = vmatprep.mubr.msk.bf16.mxu0 %vm97_vm2, %v4126_v34  ;;  %v4530_v34 = vld [vmem:[%s6183_s5 + $0x238] sm:$0xff]  }
 0x343   :  { %4723 = vtanh.f32 %v1943_v57  ;;  %2227 = vmatprep.subr.bf16.mxu0 %v4760_v56  ;;  %v4532_v57 = vld [vmem:[%s6183_s5 + $0x240] sm:$0xff]  }
 0x344   :  { %v4720_v53 = vpop.eup %4719  ;;  %4725 = vtanh.f32 %v1932_v51  ;;  %v4552_v51 = vld [vmem:[%s6183_s5 + $0x2e0] sm:$0xff]  }
 0x345   :  { %v4722_v37 = vpop.eup %4721  ;;  %v1881_v20 = vpop.f32.mrb[12].mxu1  ;;  %v4129_v16 = vpack.c.bf16 %v4720_v53, %v4720_v53  ;;  %4727 = vtanh.f32 %v1937_v11  ;;  %v4534_v53 = vld [vmem:[%s6183_s5 + $0x248] sm:$0xff]   ;;  %v4555_v11 = vld [vmem:[%s6183_s5 + $0x170] sm:$0xff]  }
 0x346   :  { %v4130_v55 = vpack.c.bf16 %v4722_v37, %v4722_v37  ;;  %v5745_v15 = vadd.f32 %v5714_v18, %v1881_v20  ;;  %2228 = vmatpush1.bf16.msra.mxu0 %v4505_v14  ;;  %v1883_v4 = vpop.f32.mrb[13].mxu1  ;;  %4729 = vtanh.f32 %v1942_v29  ;;  %v4533_v14 = vld [vmem:[%s6183_s5 + $0xc8] sm:$0xff]   ;;  %v4535_v37 = vld [vmem:[%s6183_s5 + $0xd0] sm:$0xff]  }
 0x347   :  { %v5754_v58 = vadd.f32 %v5708_v9, %v1883_v4  ;;  %v1885_v59 = vpop.f32.mrb[14].mxu1  ;;  %2229 = vmatprep.subr.bf16.mxu0 %v4760_v56  ;;  %v4536_v20 = vld [vmem:[%s6183_s5 + $0x250] sm:$0xff]   ;;  %v4538_v4 = vld [vmem:[%s6183_s5 + $0x258] sm:$0xff]   ;;  %v4562_v29 = vld [vmem:[%s6183_s5 + $0x308] sm:$0xff]  }
 0x348   :  { %v5758_v24 = vadd.f32 %v5714_v18, %v1885_v59  ;;  %v1887_v17 = vpop.f32.mrb[15].mxu1  ;;  %3905 = vmatprep.mubr.msk.bf16.mxu1 %vm97_vm2, %v4130_v55  ;;  %v4537_v55 = vld [vmem:[%s6183_s5 + $0xd8] sm:$0xff]  }
 0x349   :  { %2513 = vmatmul.mubr.bf16.vlgmr.msra.gmra.mrb[20].mxu1 %v4129_v16  ;;  %v1947_v36 = vadd.f32 %v5708_v9, %v1887_v17  ;;  %v4543_v17 = vld [vmem:[%s6183_s5 + $0x140] sm:$0xff]  }
 0x34a   :  { %2230 = vmatpush1.bf16.msra.mxu0 %v4507_v22  ;;  %2737 = vmatpush1.bf16.msra.mxu1 %v4508_v35  ;;  %v4541_v22 = vld [vmem:[%s6183_s5 + $0xe8] sm:$0xff]  }
 0x34b   :  { %2231 = vmatprep.subr.bf16.mxu0 %v4760_v56  ;;  %2738 = vmatprep.subr.bf16.mxu1 %v4760_v56  ;;  %4731 = vtanh.f32 %v1947_v36  ;;  %v4542_v35 = vld [vmem:[%s6183_s5 + $0x268] sm:$0xff]  }
 0x34c   :  { %4733 = vtanh.f32 %v5720_v41  ;;  %v4539_v41 = vld [vmem:[%s6183_s5 + $0xe0] sm:$0xff]  }
 0x34d   :  { %v4724_v62 = vpop.eup %4723  ;;  %v1891_v25 = vpop.f32.mrb[16].mxu1  ;;  %4735 = vtanh.f32 %v5733_v49  ;;  %v4540_v49 = vld [vmem:[%s6183_s5 + $0x260] sm:$0xff]  }
 0x34e   :  { %v4134_v63 = vpack.c.bf16 %v4724_v62, %v4724_v62  ;;  %v5770_v1 = vadd.f32 %v5714_v18, %v1891_v25  ;;  %2232 = vmatpush1.bf16.msra.mxu0 %v4509_v60  ;;  %2739 = vmatpush1.bf16.msra.mxu1 %v4510_v61  ;;  %v1893_v2 = vpop.f32.mrb[17].mxu1  ;;  %4737 = vtanh.f32 %v5758_v24  ;;  %v4544_v24 = vld [vmem:[%s6183_s5 + $0x270] sm:$0xff]   ;;  %v4545_v62 = vld [vmem:[%s6183_s5 + $0x148] sm:$0xff]   ;;  %v4546_v25 = vld [vmem:[%s6183_s5 + $0x278] sm:$0xff]  }
 0x34f   :  { %v5779_v7 = vadd.f32 %v5708_v9, %v1893_v2  ;;  %v1895_v50 = vpop.f32.mrb[18].mxu1  ;;  %2233 = vmatprep.subr.bf16.mxu0 %v4760_v56  ;;  %2740 = vmatprep.subr.bf16.mxu1 %v4760_v56 }
 0x350   :  { %v5784_v19 = vadd.f32 %v5714_v18, %v1895_v50  ;;  %v1897_v40 = vpop.f32.mrb[19].mxu1  ;;  %3971 = vmatprep.mubr.msk.bf16.mxu1 %vm97_vm2, %v4134_v63  ;;  %v4726_v18 = vpop.eup %4725 }
 0x351   :  { %v5788_v0 = vadd.f32 %v5708_v9, %v1897_v40  ;;  %v4728_v23 = vpop.eup %4727  ;;  %v4523_v9 = vld [vmem:[%s6183_s5 + $0xa0] sm:$0xff]   ;;  %v4125_v27 = vpack.c.bf16 %v4726_v18, %v4726_v18 }
 0x352   :  { %2234 = vmatpush1.bf16.msra.mxu0 %v4511_v3  ;;  %2741 = vmatpush1.bf16.msra.mxu1 %v4512_v54  ;;  %v4128_v39 = vpack.c.bf16 %v4728_v23, %v4728_v23  ;;  %v4730_v42 = vpop.eup %4729  ;;  %v4547_v3 = vld [vmem:[%s6183_s5 + $0x150] sm:$0xff]  }
 0x353   :  { %2235 = vmatprep.subr.bf16.mxu0 %v4760_v56  ;;  %2742 = vmatprep.subr.bf16.mxu1 %v4760_v56  ;;  %v4133_v47 = vpack.c.bf16 %v4730_v42, %v4730_v42  ;;  %4739 = vtanh.f32 %v5788_v0  ;;  %v4548_v54 = vld [vmem:[%s6183_s5 + $0x2d0] sm:$0xff]   ;;  %v4549_v0 = vld [vmem:[%s6183_s5 + $0x158] sm:$0xff]   ;;  %v4569_v42 = vld [vmem:[%s6183_s5 + $0x200] sm:$0xff]  }
 0x354   :  { %4741 = vtanh.f32 %v5727_v45  ;;  %v4559_v45 = vld [vmem:[%s6183_s5 + $0x180] sm:$0xff]  }
 0x355   :  { %v4732_v43 = vpop.eup %4731  ;;  %4743 = vtanh.f32 %v5754_v58  ;;  %v4560_v58 = vld [vmem:[%s6183_s5 + $0x300] sm:$0xff]  }
 0x356   :  { %2236 = vmatpush1.bf16.msra.mxu0 %v4513_v5  ;;  %2743 = vmatpush1.bf16.msra.mxu1 %v4514_v48  ;;  %v4138_v6 = vpack.c.bf16 %v4732_v43, %v4732_v43  ;;  %v4734_v16 = vpop.eup %4733  ;;  %v4550_v5 = vld [vmem:[%s6183_s5 + $0x2d8] sm:$0xff]   ;;  %v4551_v48 = vld [vmem:[%s6183_s5 + $0x160] sm:$0xff]   ;;  %4745 = vtanh.f32 %v5784_v19  ;;  %v4564_v19 = vld [vmem:[%s6183_s5 + $0x310] sm:$0xff]  }
 0x357   :  { %2237 = vmatprep.subr.bf16.mxu0 %v4760_v56  ;;  %2744 = vmatprep.subr.bf16.mxu1 %v4760_v56  ;;  %v4736_v59 = vpop.eup %4735  ;;  %v4127_v60 = vpack.c.bf16 %v4734_v16, %v4734_v16  ;;  %v4570_v43 = vld [vmem:[%s6183_s5 + $0x208] sm:$0xff]   ;;  %4747 = vtanh.f32 %v5745_v15 }
 0x358   :  { %v4132_v61 = vpack.c.bf16 %v4736_v59, %v4736_v59  ;;  %v4738_v63 = vpop.eup %4737  ;;  %4749 = vtanh.f32 %v5779_v7  ;;  %v4574_v15 = vld [vmem:[%s6183_s5 + $0x228] sm:$0xff]   ;;  %v4575_v7 = vld [vmem:[%s6183_s5 + $0x280] sm:$0xff]  }
 0x359   :  { %v4137_v50 = vpack.c.bf16 %v4738_v63, %v4738_v63  ;;  %4751 = vtanh.f32 %v5770_v1  ;;  %v4585_v63 = vld [vmem:[%s6185_s7] sm:$0xff]  }
 0x35a   :  { %2238 = vmatpush1.bf16.msra.mxu0 %v4515_v26  ;;  %2745 = vmatpush1.bf16.msra.mxu1 %v4516_v8  ;;  %v4553_v26 = vld [vmem:[%s6183_s5 + $0x168] sm:$0xff]  }
 0x35b   :  { %2239 = vmatprep.subr.bf16.mxu0 %v4760_v56  ;;  %2746 = vmatprep.subr.bf16.mxu1 %v4760_v56  ;;  %v4554_v8 = vld [vmem:[%s6183_s5 + $0x2e8] sm:$0xff]  }
 0x35d   :  { %v4740_v2 = vpop.eup %4739 }
 0x35e   :  { %2240 = vmatpush1.bf16.msra.mxu0 %v4517_v10  ;;  %2747 = vmatpush1.bf16.msra.mxu1 %v4518_v46  ;;  %v4142_v40 = vpack.c.bf16 %v4740_v2, %v4740_v2  ;;  %v4556_v10 = vld [vmem:[%s6183_s5 + $0x2f0] sm:$0xff]   ;;  %v4557_v46 = vld [vmem:[%s6183_s5 + $0x178] sm:$0xff]   ;;  %v4742_v36 = vpop.eup %4741 }
 0x35f   :  { %2241 = vmatprep.subr.bf16.mxu0 %v4760_v56  ;;  %2748 = vmatprep.subr.bf16.mxu1 %v4760_v56  ;;  %v4131_v18 = vpack.c.bf16 %v4742_v36, %v4742_v36 }
 0x362   :  { %2242 = vmatpush1.bf16.msra.mxu0 %v4519_v21  ;;  %2749 = vmatpush1.bf16.msra.mxu1 %v4520_v31  ;;  %v4558_v21 = vld [vmem:[%s6183_s5 + $0x2f8] sm:$0xff]   ;;  %v4561_v31 = vld [vmem:[%s6183_s5 + $0x188] sm:$0xff]  }
 0x363   :  { %2243 = vmatprep.subr.bf16.mxu0 %v4760_v56  ;;  %2750 = vmatprep.subr.bf16.mxu1 %v4760_v56 }
 0x366   :  { %2244 = vmatpush1.bf16.msra.mxu0 %v4521_v30  ;;  %2751 = vmatpush1.bf16.msra.mxu1 %v4522_v38  ;;  %v4744_v30 = vpop.eup %4743  ;;  %v4563_v38 = vld [vmem:[%s6183_s5 + $0x1e0] sm:$0xff]  }
 0x367   :  { %2352 = vmatprep.subr.bf16.mxu0 %v4760_v56  ;;  %2752 = vmatprep.subr.bf16.mxu1 %v4760_v56  ;;  %v4136_v23 = vpack.c.bf16 %v4744_v30, %v4744_v30  ;;  %v4592_v30 = vld [vmem:[%s6185_s7 + $0x38] sm:$0xff]  }
 0x369   :  { %2258 = vmatmul.mubr.bf16.vlgmr.msra.gmra.mrb[60].mxu0 %v4125_v27  ;;  %v4566_v27 = vld [vmem:[%s6183_s5 + $0x318] sm:$0xff]  }
 0x36a   :  { %2353 = vmatpush1.bf16.msra.mxu0 %v4523_v9  ;;  %3872 = vmatprep.mubr.msk.bf16.mxu0 %vm97_vm2, %v4128_v39  ;;  %v4565_v9 = vld [vmem:[%s6183_s5 + $0x1e8] sm:$0xff]   ;;  %v4567_v39 = vld [vmem:[%s6183_s5 + $0x1f0] sm:$0xff]  }
 0x36b   :  { %2753 = vmatpush1.bf16.msra.mxu1 %v4524_v12  ;;  %2354 = vmatprep.subr.bf16.mxu0 %v4760_v56  ;;  %v4746_v12 = vpop.eup %4745 }
 0x36c   :  { %2754 = vmatprep.subr.bf16.mxu1 %v4760_v56 }
 0x36e   :  { %2355 = vmatpush1.bf16.msra.mxu0 %v4525_v32  ;;  %v4141_v32 = vpack.c.bf16 %v4746_v12, %v4746_v12  ;;  %v4595_v12 = vld [vmem:[%s6186_s9 + $0x10] sm:$0xff]  }
 0x36f   :  { %2755 = vmatpush1.bf16.msra.mxu1 %v4526_v13  ;;  %2356 = vmatprep.subr.bf16.mxu0 %v4760_v56  ;;  %v4568_v13 = vld [vmem:[%s6183_s5 + $0x1f8] sm:$0xff]  }
 0x370   :  { %2992 = vmatprep.subr.bf16.mxu1 %v4760_v56 }
 0x372   :  { %2769 = vmatmul.mubr.bf16.vlgmr.msra.gmra.mrb[24].mxu1 %v4133_v47  ;;  %2357 = vmatpush1.bf16.msra.mxu0 %v4527_v44  ;;  %v4571_v44 = vld [vmem:[%s6183_s5 + $0x210] sm:$0xff]   ;;  %v4573_v47 = vld [vmem:[%s6183_s5 + $0x220] sm:$0xff]  }
 0x373   :  { %2993 = vmatpush1.bf16.msra.mxu1 %v4528_v33  ;;  %4037 = vmatprep.mubr.msk.bf16.mxu1 %vm97_vm2, %v4138_v6  ;;  %v4572_v33 = vld [vmem:[%s6183_s5 + $0x218] sm:$0xff]   ;;  %v4748_v6 = vpop.eup %4747 }
 0x374   :  { %2358 = vmatprep.subr.bf16.mxu0 %v4760_v56  ;;  %2994 = vmatprep.subr.bf16.mxu1 %v4760_v56 }
 0x376   :  { %2359 = vmatpush1.bf16.msra.mxu0 %v4529_v52  ;;  %v4750_v52 = vpop.eup %4749 }
 0x377   :  { %2995 = vmatpush1.bf16.msra.mxu1 %v4530_v34  ;;  %2360 = vmatprep.subr.bf16.mxu0 %v4760_v56  ;;  %v4135_v34 = vpack.c.bf16 %v4748_v6, %v4748_v6  ;;  %v4752_v1 = vpop.eup %4751 }
 0x378   :  { %2996 = vmatprep.subr.bf16.mxu1 %v4760_v56 }
 0x37a   :  { %2361 = vmatpush1.bf16.msra.mxu0 %v4531_v28  ;;  %v4140_v28 = vpack.c.bf16 %v4750_v52, %v4750_v52 }
 0x37b   :  { %2997 = vmatpush1.bf16.msra.mxu1 %v4532_v57  ;;  %2362 = vmatprep.subr.bf16.mxu0 %v4760_v56  ;;  %v4576_v57 = vld [vmem:[%s6183_s5 + $0x288] sm:$0xff]  }
 0x37c   :  { %2998 = vmatprep.subr.bf16.mxu1 %v4760_v56 }
 0x37e   :  { %2363 = vmatpush1.bf16.msra.mxu0 %v4533_v14  ;;  %v4577_v14 = vld [vmem:[%s6183_s5 + $0x290] sm:$0xff]  }
 0x37f   :  { %2999 = vmatpush1.bf16.msra.mxu1 %v4534_v53  ;;  %2364 = vmatprep.subr.bf16.mxu0 %v4760_v56  ;;  %v4578_v53 = vld [vmem:[%s6183_s5 + $0x298] sm:$0xff]  }
 0x380   :  { %3000 = vmatprep.subr.bf16.mxu1 %v4760_v56 }
 0x382   :  { %2365 = vmatpush1.bf16.msra.mxu0 %v4535_v37  ;;  %v4579_v37 = vld [vmem:[%s6183_s5 + $0x2a0] sm:$0xff]  }
 0x383   :  { %3001 = vmatpush1.bf16.msra.mxu1 %v4536_v20  ;;  %2366 = vmatprep.subr.bf16.mxu0 %v4760_v56  ;;  %v4580_v20 = vld [vmem:[%s6183_s5 + $0x2a8] sm:$0xff]  }
 0x384   :  { %3002 = vmatprep.subr.bf16.mxu1 %v4760_v56 }
 0x386   :  { %2367 = vmatpush1.bf16.msra.mxu0 %v4537_v55  ;;  %v4581_v55 = vld [vmem:[%s6183_s5 + $0x2b0] sm:$0xff]  }
 0x387   :  { %3003 = vmatpush1.bf16.msra.mxu1 %v4538_v4  ;;  %2368 = vmatprep.subr.bf16.mxu0 %v4760_v56  ;;  %v4582_v4 = vld [vmem:[%s6183_s5 + $0x2b8] sm:$0xff]  }
 0x388   :  { %3004 = vmatprep.subr.bf16.mxu1 %v4760_v56 }
 0x38a   :  { %2369 = vmatpush1.bf16.msra.mxu0 %v4539_v41  ;;  %v4583_v41 = vld [vmem:[%s6183_s5 + $0x2c0] sm:$0xff]  }
 0x38b   :  { %3005 = vmatpush1.bf16.msra.mxu1 %v4540_v49  ;;  %2370 = vmatprep.subr.bf16.mxu0 %v4760_v56  ;;  %v4584_v49 = vld [vmem:[%s6183_s5 + $0x2c8] sm:$0xff]  }
 0x38c   :  { %3006 = vmatprep.subr.bf16.mxu1 %v4760_v56 }
 0x38e   :  { %2371 = vmatpush1.bf16.msra.mxu0 %v4541_v22  ;;  %v4139_v22 = vpack.c.bf16 %v4752_v1, %v4752_v1 }
 0x38f   :  { %3007 = vmatpush1.bf16.msra.mxu1 %v4542_v35  ;;  %2608 = vmatprep.subr.bf16.mxu0 %v4760_v56 }
 0x390   :  { %3008 = vmatprep.subr.bf16.mxu1 %v4760_v56 }
 0x391   :  { %2385 = vmatmul.mubr.bf16.vlgmr.msra.gmra.mrb[64].mxu0 %v4127_v60 }
 0x392   :  { %2609 = vmatpush1.bf16.msra.mxu0 %v4543_v17  ;;  %3938 = vmatprep.mubr.msk.bf16.mxu0 %vm97_vm2, %v4132_v61 }
 0x393   :  { %3009 = vmatpush1.bf16.msra.mxu1 %v4544_v24  ;;  %2610 = vmatprep.subr.bf16.mxu0 %v4760_v56 }
 0x394   :  { %3010 = vmatprep.subr.bf16.mxu1 %v4760_v56 }
 0x396   :  { %2611 = vmatpush1.bf16.msra.mxu0 %v4545_v62 }
 0x397   :  { %3011 = vmatpush1.bf16.msra.mxu1 %v4546_v25  ;;  %2612 = vmatprep.subr.bf16.mxu0 %v4760_v56  ;;  %v4761_v25 = vmov 0.0  }
 0x398   :  { %3248 = vmatprep.subr.bf16.mxu1 %v4760_v56 }
 0x39a   :  { %3025 = vmatmul.mubr.bf16.vlgmr.msra.gmra.mrb[28].mxu1 %v4137_v50  ;;  %2613 = vmatpush1.bf16.msra.mxu0 %v4547_v3 }
 0x39b   :  { %3249 = vmatpush1.bf16.msra.mxu1 %v4548_v54  ;;  %4103 = vmatprep.mubr.msk.bf16.mxu1 %vm97_vm2, %v4142_v40  ;;  %v4587_v40 = vld [vmem:[%s6185_s7 + $0x10] sm:$0xff]  }
 0x39c   :  { %2614 = vmatprep.subr.bf16.mxu0 %v4760_v56  ;;  %3250 = vmatprep.subr.bf16.mxu1 %v4760_v56 }
 0x39e   :  { %2615 = vmatpush1.bf16.msra.mxu0 %v4549_v0 }
 0x39f   :  { %3251 = vmatpush1.bf16.msra.mxu1 %v4550_v5  ;;  %2616 = vmatprep.subr.bf16.mxu0 %v4760_v56 }
 0x3a0   :  { %3252 = vmatprep.subr.bf16.mxu1 %v4760_v56 }
 0x3a2   :  { %2617 = vmatpush1.bf16.msra.mxu0 %v4551_v48 }
 0x3a3   :  { %3253 = vmatpush1.bf16.msra.mxu1 %v4552_v51  ;;  %2618 = vmatprep.subr.bf16.mxu0 %v4760_v56 }
 0x3a4   :  { %3254 = vmatprep.subr.bf16.mxu1 %v4760_v56 }
 0x3a6   :  { %2619 = vmatpush1.bf16.msra.mxu0 %v4553_v26 }
 0x3a7   :  { %3255 = vmatpush1.bf16.msra.mxu1 %v4554_v8  ;;  %2620 = vmatprep.subr.bf16.mxu0 %v4760_v56  ;;  %v4588_v8 = vld [vmem:[%s6185_s7 + $0x18] sm:$0xff]  }
 0x3a8   :  { %3256 = vmatprep.subr.bf16.mxu1 %v4760_v56 }
 0x3aa   :  { %2621 = vmatpush1.bf16.msra.mxu0 %v4555_v11  ;;  %v4589_v11 = vld [vmem:[%s6185_s7 + $0x20] sm:$0xff]  }
 0x3ab   :  { %3257 = vmatpush1.bf16.msra.mxu1 %v4556_v10  ;;  %2622 = vmatprep.subr.bf16.mxu0 %v4760_v56  ;;  %v4590_v10 = vld [vmem:[%s6185_s7 + $0x28] sm:$0xff]  }
 0x3ac   :  { %3258 = vmatprep.subr.bf16.mxu1 %v4760_v56 }
 0x3ae   :  { %2623 = vmatpush1.bf16.msra.mxu0 %v4557_v46 }
 0x3af   :  { %3259 = vmatpush1.bf16.msra.mxu1 %v4558_v21  ;;  %2624 = vmatprep.subr.bf16.mxu0 %v4760_v56 }
 0x3b0   :  { %3260 = vmatprep.subr.bf16.mxu1 %v4760_v56 }
 0x3b2   :  { %2625 = vmatpush1.bf16.msra.mxu0 %v4559_v45 }
 0x3b3   :  { %3261 = vmatpush1.bf16.msra.mxu1 %v4560_v58  ;;  %2626 = vmatprep.subr.bf16.mxu0 %v4760_v56 }
 0x3b4   :  { %3262 = vmatprep.subr.bf16.mxu1 %v4760_v56 }
 0x3b6   :  { %2627 = vmatpush1.bf16.msra.mxu0 %v4561_v31  ;;  %v4591_v31 = vld [vmem:[%s6185_s7 + $0x30] sm:$0xff]  }
 0x3b7   :  { %3263 = vmatpush1.bf16.msra.mxu1 %v4562_v29  ;;  %2864 = vmatprep.subr.bf16.mxu0 %v4760_v56 }
 0x3b8   :  { %3264 = vmatprep.subr.bf16.mxu1 %v4760_v56 }
 0x3b9   :  { %2641 = vmatmul.mubr.bf16.vlgmr.msra.gmra.mrb[68].mxu0 %v4131_v18 }
 0x3ba   :  { %2865 = vmatpush1.bf16.msra.mxu0 %v4563_v38  ;;  %4004 = vmatprep.mubr.msk.bf16.mxu0 %vm97_vm2, %v4136_v23 }
 0x3bb   :  { %3265 = vmatpush1.bf16.msra.mxu1 %v4564_v19  ;;  %2866 = vmatprep.subr.bf16.mxu0 %v4760_v56 }
 0x3bc   :  { %3266 = vmatprep.subr.bf16.mxu1 %v4760_v56 }
 0x3be   :  { %2867 = vmatpush1.bf16.msra.mxu0 %v4565_v9  ;;  %v4593_v9 = vld [vmem:[%s6186_s9] sm:$0xff]  }
 0x3bf   :  { %3267 = vmatpush1.bf16.msra.mxu1 %v4566_v27  ;;  %2868 = vmatprep.subr.bf16.mxu0 %v4760_v56  ;;  %v4594_v27 = vld [vmem:[%s6186_s9 + $0x8] sm:$0xff]  }
 0x3c0   :  { %4181 = vmatprep.subr.bf16.mxu1 %v4761_v25 }
 0x3c2   :  { %3281 = vmatmul.mubr.bf16.vlgmr.msra.gmra.mrb[32].mxu1 %v4141_v32  ;;  %2869 = vmatpush1.bf16.msra.mxu0 %v4567_v39  ;;  %v4596_v39 = vld [vmem:[%s6186_s9 + $0x18] sm:$0xff]  }
 0x3c3   :  { %2870 = vmatprep.subr.bf16.mxu0 %v4760_v56  ;;  %4197 = vmatprep.mubr.msk.bf16.mxu1 %vm4762_vm5, %v4761_v25 }
 0x3c4   :  { %4182 = vmatpush3.bf16.msra.mxu1 %v4593_v9 }
 0x3c5   :  { %4183 = vmatprep.subr.bf16.mxu1 %v4761_v25 }
 0x3c6   :  { %2871 = vmatpush1.bf16.msra.mxu0 %v4568_v13 }
 0x3c7   :  { %2872 = vmatprep.subr.bf16.mxu0 %v4760_v56 }
 0x3c8   :  { %4184 = vmatpush3.bf16.msra.mxu1 %v4594_v27 }
 0x3c9   :  { %4185 = vmatprep.subr.bf16.mxu1 %v4761_v25 }
 0x3ca   :  { %2873 = vmatpush1.bf16.msra.mxu0 %v4569_v42 }
 0x3cb   :  { %2874 = vmatprep.subr.bf16.mxu0 %v4760_v56 }
 0x3cc   :  { %4186 = vmatpush3.bf16.msra.mxu1 %v4595_v12 }
 0x3cd   :  { %4187 = vmatprep.subr.bf16.mxu1 %v4761_v25 }
 0x3ce   :  { %2875 = vmatpush1.bf16.msra.mxu0 %v4570_v43 }
 0x3cf   :  { %2876 = vmatprep.subr.bf16.mxu0 %v4760_v56 }
 0x3d0   :  { %4188 = vmatpush3.bf16.msra.mxu1 %v4596_v39 }
 0x3d1   :  { %4189 = vmatprep.subr.bf16.mxu1 %v4761_v25 }
 0x3d2   :  { %2877 = vmatpush1.bf16.msra.mxu0 %v4571_v44 }
 0x3d3   :  { %2878 = vmatprep.subr.bf16.mxu0 %v4760_v56 }
 0x3d6   :  { %2879 = vmatpush1.bf16.msra.mxu0 %v4572_v33 }
 0x3d7   :  { %2880 = vmatprep.subr.bf16.mxu0 %v4760_v56 }
 0x3da   :  { %2881 = vmatpush1.bf16.msra.mxu0 %v4573_v47 }
 0x3db   :  { %2882 = vmatprep.subr.bf16.mxu0 %v4760_v56 }
 0x3de   :  { %2883 = vmatpush1.bf16.msra.mxu0 %v4574_v15 }
 0x3df   :  { %3120 = vmatprep.subr.bf16.mxu0 %v4760_v56 }
 0x3e1   :  { %2897 = vmatmul.mubr.bf16.vlgmr.msra.gmra.mrb[72].mxu0 %v4135_v34 }
 0x3e2   :  { %3121 = vmatpush1.bf16.msra.mxu0 %v4575_v7  ;;  %4070 = vmatprep.mubr.msk.bf16.mxu0 %vm97_vm2, %v4140_v28 }
 0x3e3   :  { %3122 = vmatprep.subr.bf16.mxu0 %v4760_v56 }
 0x3e6   :  { %3123 = vmatpush1.bf16.msra.mxu0 %v4576_v57 }
 0x3e7   :  { %3124 = vmatprep.subr.bf16.mxu0 %v4760_v56 }
 0x3ea   :  { %3125 = vmatpush1.bf16.msra.mxu0 %v4577_v14 }
 0x3eb   :  { %3126 = vmatprep.subr.bf16.mxu0 %v4760_v56 }
 0x3ee   :  { %3127 = vmatpush1.bf16.msra.mxu0 %v4578_v53 }
 0x3ef   :  { %3128 = vmatprep.subr.bf16.mxu0 %v4760_v56 }
 0x3f2   :  { %3129 = vmatpush1.bf16.msra.mxu0 %v4579_v37 }
 0x3f3   :  { %3130 = vmatprep.subr.bf16.mxu0 %v4760_v56 }
 0x3f6   :  { %3131 = vmatpush1.bf16.msra.mxu0 %v4580_v20 }
 0x3f7   :  { %3132 = vmatprep.subr.bf16.mxu0 %v4760_v56 }
 0x3fa   :  { %3133 = vmatpush1.bf16.msra.mxu0 %v4581_v55 }
 0x3fb   :  { %3134 = vmatprep.subr.bf16.mxu0 %v4760_v56 }
 0x3fe   :  { %3135 = vmatpush1.bf16.msra.mxu0 %v4582_v4  ;;  %v4104_v4 = vld [vmem:[%s6187_s6] ss:$0 sm:$0xff] }
 0x3ff   :  { %3136 = vmatprep.subr.bf16.mxu0 %v4760_v56 }
 0x402   :  { %3137 = vmatpush1.bf16.msra.mxu0 %v4583_v41 }
 0x403   :  { %3138 = vmatprep.subr.bf16.mxu0 %v4760_v56  ;;  %v4586_v56 = vld [vmem:[%s6185_s7 + $0x8] sm:$0xff]  }
 0x406   :  { %3139 = vmatpush1.bf16.msra.mxu0 %v4584_v49 }
 0x407   :  { %4161 = vmatprep.subr.bf16.mxu0 %v4761_v25 }
 0x409   :  { %3153 = vmatmul.mubr.bf16.vlgmr.msra.gmra.mrb[76].mxu0 %v4139_v22 }
 0x40a   :  { %4162 = vmatpush3.bf16.msra.mxu0 %v4585_v63  ;;  %4177 = vmatprep.mubr.msk.bf16.mxu0 %vm4762_vm5, %v4761_v25 }
 0x40b   :  { %4163 = vmatprep.subr.bf16.mxu0 %v4761_v25 }
 0x40e   :  { %4164 = vmatpush3.bf16.msra.mxu0 %v4586_v56 }
 0x40f   :  { %4165 = vmatprep.subr.bf16.mxu0 %v4761_v25 }
 0x412   :  { %4166 = vmatpush3.bf16.msra.mxu0 %v4587_v40 }
 0x413   :  { %4167 = vmatprep.subr.bf16.mxu0 %v4761_v25 }
 0x414   :  { %v2153_v35 = vpop.f32.mrb[56].mxu0 }
 0x415   :  { %v2155_v16 = vpop.f32.mrb[57].mxu0 }
 0x416   :  { %v2156_v59 = vpop.f32.mrb[58].mxu0  ;;  %4168 = vmatpush3.bf16.msra.mxu0 %v4588_v8 }
 0x417   :  { %v2157_v17 = vpop.f32.mrb[59].mxu0  ;;  %4169 = vmatprep.subr.bf16.mxu0 %v4761_v25  ;;  %v4597_v59 = vld [vmem:[%s6186_s9 + $0x20] sm:$0xff]  }
 0x418   :  { %4190 = vmatpush3.bf16.msra.mxu1 %v4597_v59  ;;  %v4598_v17 = vld [vmem:[%s6186_s9 + $0x28] sm:$0xff]  }
 0x419   :  { %4191 = vmatprep.subr.bf16.mxu1 %v4761_v25 }
 0x41a   :  { %4170 = vmatpush3.bf16.msra.mxu0 %v4589_v11 }
 0x41b   :  { %4171 = vmatprep.subr.bf16.mxu0 %v4761_v25 }
 0x41c   :  { %v2514_v60 = vpop.f32.mrb[20].mxu1  ;;  %4192 = vmatpush3.bf16.msra.mxu1 %v4598_v17 }
 0x41d   :  { %v2516_v24 = vpop.f32.mrb[21].mxu1  ;;  %4193 = vmatprep.subr.bf16.mxu1 %v4761_v25 }
 0x41e   :  { %v2517_v61 = vpop.f32.mrb[22].mxu1  ;;  %4172 = vmatpush3.bf16.msra.mxu0 %v4590_v10  ;;  %v4600_v24 = vld [vmem:[%s6186_s9 + $0x38] sm:$0xff]  }
 0x41f   :  { %v2518_v62 = vpop.f32.mrb[23].mxu1  ;;  %4173 = vmatprep.subr.bf16.mxu0 %v4761_v25  ;;  %v4105_v61 = vld [vmem:[%s6188_s8] ss:$0 sm:$0xff] }
 0x422   :  { %4174 = vmatpush3.bf16.msra.mxu0 %v4591_v31 }
 0x423   :  { %4175 = vmatprep.subr.bf16.mxu0 %v4761_v25 }
 0x426   :  { %4176 = vmatpush3.bf16.msra.mxu0 %v4592_v30 }
 0x43c   :  { %v2259_v2 = vpop.f32.mrb[60].mxu0 }
 0x43d   :  { %v2260_v3 = vadd.f32 %v2259_v2, %v2153_v35  ;;  %v2261_v54 = vpop.f32.mrb[61].mxu0 }
 0x43e   :  { %v2262_v50 = vpop.f32.mrb[62].mxu0 }
 0x43f   :  { %v2263_v0 = vpop.f32.mrb[63].mxu0 }
 0x445   :  { %v2770_v5 = vpop.f32.mrb[24].mxu1 }
 0x446   :  { %v2772_v48 = vpop.f32.mrb[25].mxu1 }
 0x447   :  { %v2773_v51 = vpop.f32.mrb[26].mxu1 }
 0x448   :  { %v2774_v26 = vpop.f32.mrb[27].mxu1 }
 0x464   :  { %v2386_v46 = vpop.f32.mrb[64].mxu0 }
 0x465   :  { %v2392_v21 = vadd.f32 %v2386_v46, %v2260_v3  ;;  %v2388_v45 = vpop.f32.mrb[65].mxu0 }
 0x466   :  { %v2389_v58 = vpop.f32.mrb[66].mxu0 }
 0x467   :  { %v2390_v29 = vpop.f32.mrb[67].mxu0  ;;  %v2520_v36 = vadd.f32 %v2514_v60, %v2392_v21  ;;  %v4599_v60 = vld [vmem:[%s6186_s9 + $0x30] sm:$0xff]  }
 0x468   :  { %4194 = vmatpush3.bf16.msra.mxu1 %v4599_v60 }
 0x469   :  { %4195 = vmatprep.subr.bf16.mxu1 %v4761_v25  ;;  %v4114_v25 = vld [vmem:[%s6189_s10] ss:$0 sm:$0xff] }
 0x46c   :  { %4196 = vmatpush3.bf16.msra.mxu1 %v4600_v24 }
 0x46d   :  { %v3026_v38 = vpop.f32.mrb[28].mxu1 }
 0x46e   :  { %v3028_v18 = vpop.f32.mrb[29].mxu1 }
 0x46f   :  { %v3029_v19 = vpop.f32.mrb[30].mxu1 }
 0x470   :  { %v3030_v23 = vpop.f32.mrb[31].mxu1 }
 0x48c   :  { %v2642_v32 = vpop.f32.mrb[68].mxu0 }
 0x48d   :  { %v2648_v13 = vadd.f32 %v2642_v32, %v2520_v36  ;;  %v2644_v42 = vpop.f32.mrb[69].mxu0 }
 0x48e   :  { %v2645_v43 = vpop.f32.mrb[70].mxu0 }
 0x48f   :  { %v2646_v44 = vpop.f32.mrb[71].mxu0  ;;  %v2776_v33 = vadd.f32 %v2770_v5, %v2648_v13 }
 0x495   :  { %v3282_v47 = vpop.f32.mrb[32].mxu1 }
 0x496   :  { %v3284_v15 = vpop.f32.mrb[33].mxu1 }
 0x497   :  { %v3285_v6 = vpop.f32.mrb[34].mxu1 }
 0x498   :  { %v3286_v52 = vpop.f32.mrb[35].mxu1 }
 0x4b4   :  { %v2898_v7 = vpop.f32.mrb[72].mxu0 }
 0x4b5   :  { %v2904_v34 = vadd.f32 %v2898_v7, %v2776_v33  ;;  %v2900_v28 = vpop.f32.mrb[73].mxu0 }
 0x4b6   :  { %v2901_v57 = vpop.f32.mrb[74].mxu0 }
 0x4b7   :  { %v2902_v14 = vpop.f32.mrb[75].mxu0  ;;  %v3032_v53 = vadd.f32 %v3026_v38, %v2904_v34 }
 0x4dc   :  { %v3154_v37 = vpop.f32.mrb[76].mxu0 }
 0x4dd   :  { %v3160_v20 = vadd.f32 %v3154_v37, %v3032_v53  ;;  %v3156_v55 = vpop.f32.mrb[77].mxu0 }
 0x4de   :  { %v3157_v41 = vpop.f32.mrb[78].mxu0 }
 0x4df   :  { %v3288_v49 = vadd.f32 %v3282_v47, %v3160_v20  ;;  %v3158_v1 = vpop.f32.mrb[79].mxu0 }
 0x4e1   :  { %v3296_v22 = vadd.f32 %v4104_v4, %v3288_v49 }
 0x4e3   :  { %4753 = vtanh.f32 %v3296_v22 }
 0x4ed   :  { %v4754_v35 = vpop.eup %4753 }
 0x4ee   :  { %v3298_v16 = vpack.c.bf16 %v4754_v35, %v4754_v35 }
 0x4f0   :  { %4178 = vmatmul.mubr.bf16.vlgmr.msra.gmra.mrb[80].mxu0 %v3298_v16 }
 0x5c3   :  { %v3404_v62 = vpop.f32.mrb[80].mxu0 }
 0x5c4   :  { %v3405_v63 = vadd.f32 %v4105_v61, %v3404_v62  ;;  %v4179_v56 = vpop.f32.mrb[81].mxu0 }
 0x5c5   :  { %v3407_v2 = vpop.f32.mrb[82].mxu0 }
 0x5c6   :  { %4755 = vtanh.f32 %v3405_v63  ;;  %v4180_v3 = vpop.f32.mrb[83].mxu0 }
 0x5d0   :  { %v4756_v54 = vpop.eup %4755 }
 0x5d1   :  { %v3411_v50 = vpack.c.bf16 %v4756_v54, %v4756_v54 }
 0x5d3   :  { %4198 = vmatmul.mubr.bf16.vlgmr.msra.gmra.mrb[36].mxu1 %v3411_v50 }
 0x6a6   :  { %v3517_v40 = vpop.f32.mrb[36].mxu1 }
 0x6a7   :  { %v3518_v0 = vadd.f32 %v4114_v25, %v3517_v40  ;;  %v4199_v5 = vpop.f32.mrb[37].mxu1 }
 0x6a8   :  { %v3520_v48 = vpop.f32.mrb[38].mxu1 }
 0x6a9   :  { %3523 = vst [vmem:[%s6190_s11] sm:$0xff] %v3518_v0  ;;  %v4200_v51 = vpop.f32.mrb[39].mxu1 }

</bundles_post_ra>
